<compile_context>
chip_gen: v6e
topology: v6e:2x2x1
jax: 0.10.0
libtpu: 0.0.40
codegen_flags: <defaults>
</compile_context>

<pallas_src>
import functools
import math

import jax
import jax.numpy as jnp
import numpy as np
from jax import lax
from jax.experimental import pallas as pl
from jax.experimental.pallas import tpu as pltpu

# ---- module hyperparameters (small, consistent with the VAE backbone transformer) ----
DMODEL = 32
NHEAD = 4
DHEAD = DMODEL // NHEAD
DIM_FF = 64
NUM_LAYERS = 2
SEQ_TGT = 8          # number of queries (tgt length)
SEQ_MEM = 8          # memory length
BATCH = 2
EPS = 1e-5           # PyTorch LayerNorm default
LANES = 128

# ---- packed parameter slab layout (one (rows, 128) f32 array) ----
# per-layer rows; weights are pre-transposed so the kernel does plain row-major matmuls,
# and every block is zero-padded to the full 128 lanes.
ROWS_W_SA = 0                     # (32, 96->128)  self-attn  in_proj_weight.T (Q cols pre-scaled)
ROWS_WO_SA = 32                   # (32, 32->128)  self-attn  out_proj.weight.T
ROWS_W_CA = 64                    # (32, 96->128)  cross-attn in_proj_weight.T (Q cols pre-scaled)
ROWS_WO_CA = 96                   # (32, 32->128)  cross-attn out_proj.weight.T
ROWS_W1 = 128                     # (32, 64->128)  linear1.weight.T
ROWS_W2 = 160                     # (64, 32->128)  linear2.weight.T
ROW_VEC = 224                     # 16 vector rows (biases + LN params), one per row
VEC_ROWS = 16
LAYER_ROWS = 240
V_BQKV_SA, V_BO_SA, V_BQKV_CA, V_BO_CA, V_B1, V_B2 = 0, 1, 2, 3, 4, 5
V_LN1G, V_LN1B, V_LN2G, V_LN2B, V_LN3G, V_LN3B = 6, 7, 8, 9, 10, 11
FINAL_NORM_ROW = NUM_LAYERS * LAYER_ROWS          # row 0 = gamma, row 1 = beta
FINAL_NORM_ROWS = 8
MASK_ROW0 = FINAL_NORM_ROW + FINAL_NORM_ROWS      # head-tiled same-batch masks + head lane mask


def _layernorm(x, g, b):
    mu = jnp.mean(x, axis=-1, keepdims=True)
    var = jnp.mean((x - mu) ** 2, axis=-1, keepdims=True)
    return (x - mu) * lax.rsqrt(var + EPS) * g + b


def _mha_core(q, k, v, blk_mask, mask_bias, wo, bo):
    """Multi-head attention on 2-D tiles via a head-block-diagonal Q.

    q: (nq, D) already scaled by 1/sqrt(d_head) (folded into packed weights).
    k, v: (nk, D).
    blk_mask:  (H*nq, D)  per-head lane mask (1 where lane belongs to the row's head).
    mask_bias: (H*nq, nk) additive same-batch mask (0 same batch, -1e30 otherwise),
               already tiled over the head blocks.
    wo: (D, 128) padded out-proj weight (transposed); bo: (1, 128) padded bias.
    Returns (nq, 128); caller slices [:, :D].
    """
    nq = q.shape[0]
    # head-block-diagonal Q: tile q along sublanes x H, zero the other heads' lanes
    q_blk = jnp.concatenate([q] * NHEAD, axis=0) * blk_mask            # (H*nq, D)
    # scores: ONE MXU push, contraction over the full D lanes (zeros outside the head)
    s = lax.dot_general(q_blk, k, (((1,), (1,)), ((), ())),
                        preferred_element_type=jnp.float32)            # (H*nq, nk)
    s = s + mask_bias                                                   # block cross-batch attn
    s = s - jnp.max(s, axis=-1, keepdims=True)
    p = jnp.exp(s)
    p = p / jnp.sum(p, axis=-1, keepdims=True)                          # exact division (tiny)
    o_all = jnp.dot(p, v, preferred_element_type=jnp.float32)           # (H*nq, D), ONE push
    o_all = o_all * blk_mask                                            # keep only own-head lanes
    o2d = o_all[0:nq]
    for h in range(1, NHEAD):                                           # merge heads: H masked adds
        o2d = o2d + o_all[h * nq:(h + 1) * nq]
    return jnp.dot(o2d, wo, preferred_element_type=jnp.float32) + bo    # (nq, 128)


def _decoder_kernel(act_ref, p_ref, out_ref, *, nt, nm):
    # act_ref rows: [tgt (nt); query_pos (nt); memory (nm); pos (nm)], row = s*BATCH + b.
    acts = act_ref[...]
    x = acts[0:nt, :]
    qp = acts[nt:2 * nt, :]
    mem = acts[2 * nt:2 * nt + nm, :]
    mem_k = mem + acts[2 * nt + nm:2 * nt + 2 * nm, :]        # cross-attn key input

    hq = NHEAD * nt
    self_mask = p_ref[MASK_ROW0:MASK_ROW0 + hq, 0:nt]                 # (H*nt, nt)
    cross_mask = p_ref[MASK_ROW0 + hq:MASK_ROW0 + 2 * hq, 0:nm]       # (H*nt, nm)
    blk_mask = p_ref[MASK_ROW0 + 2 * hq:MASK_ROW0 + 3 * hq, 0:DMODEL]  # (H*nt, D)

    for l in range(NUM_LAYERS):            # static unroll: only 2 layers, live ranges stay small
        base = l * LAYER_ROWS
        w_sa = p_ref[base + ROWS_W_SA:base + ROWS_W_SA + DMODEL, :]
        wo_sa = p_ref[base + ROWS_WO_SA:base + ROWS_WO_SA + DMODEL, :]
        w_ca = p_ref[base + ROWS_W_CA:base + ROWS_W_CA + DMODEL, :]
        wo_ca = p_ref[base + ROWS_WO_CA:base + ROWS_WO_CA + DMODEL, :]
        w1 = p_ref[base + ROWS_W1:base + ROWS_W1 + DMODEL, :]
        w2 = p_ref[base + ROWS_W2:base + ROWS_W2 + DIM_FF, :]
        # one contiguous (16, 128) load for all biases + LN params; slice in-register
        vecblk = p_ref[base + ROW_VEC:base + ROW_VEC + VEC_ROWS, :]
        b_sa = vecblk[V_BQKV_SA:V_BQKV_SA + 1, :]
        bo_sa = vecblk[V_BO_SA:V_BO_SA + 1, :]
        b_ca = vecblk[V_BQKV_CA:V_BQKV_CA + 1, :]
        bo_ca = vecblk[V_BO_CA:V_BO_CA + 1, :]
        b1 = vecblk[V_B1:V_B1 + 1, :]
        b2 = vecblk[V_B2:V_B2 + 1, :]
        ln1g = vecblk[V_LN1G:V_LN1G + 1, 0:DMODEL]
        ln1b = vecblk[V_LN1B:V_LN1B + 1, 0:DMODEL]
        ln2g = vecblk[V_LN2G:V_LN2G + 1, 0:DMODEL]
        ln2b = vecblk[V_LN2B:V_LN2B + 1, 0:DMODEL]
        ln3g = vecblk[V_LN3G:V_LN3G + 1, 0:DMODEL]
        ln3b = vecblk[V_LN3B:V_LN3B + 1, 0:DMODEL]

        # ---- self-attention: q = k = x + query_pos, v = x ; q==k -> project only [xq; x] ----
        xq = x + qp
        proj = jnp.dot(jnp.concatenate([xq, x], axis=0), w_sa,
                       preferred_element_type=jnp.float32) + b_sa          # (2nt, 128)
        sa = _mha_core(proj[0:nt, 0:DMODEL],                               # Q (pre-scaled)
                       proj[0:nt, DMODEL:2 * DMODEL],                      # K (same rows as Q)
                       proj[nt:2 * nt, 2 * DMODEL:3 * DMODEL],             # V from x rows
                       blk_mask, self_mask, wo_sa, bo_sa)[:, 0:DMODEL]
        x = _layernorm(x + sa, ln1g, ln1b)

        # ---- cross-attention: q = x + query_pos, k = memory + pos, v = memory ----
        proj = jnp.dot(jnp.concatenate([x + qp, mem_k, mem], axis=0), w_ca,
                       preferred_element_type=jnp.float32) + b_ca          # (nt+2nm, 128)
        ca = _mha_core(proj[0:nt, 0:DMODEL],
                       proj[nt:nt + nm, DMODEL:2 * DMODEL],
                       proj[nt + nm:nt + 2 * nm, 2 * DMODEL:3 * DMODEL],
                       blk_mask, cross_mask, wo_ca, bo_ca)[:, 0:DMODEL]
        x = _layernorm(x + ca, ln2g, ln2b)

        # ---- feed-forward (ReLU) on the normed stream ----
        h = jnp.maximum(jnp.dot(x, w1, preferred_element_type=jnp.float32) + b1, 0.0)
        ff = jnp.dot(h[:, 0:DIM_FF], w2, preferred_element_type=jnp.float32) + b2
        x = _layernorm(x + ff[:, 0:DMODEL], ln3g, ln3b)

    # final decoder norm (TransformerDecoder.norm)
    fg = p_ref[FINAL_NORM_ROW:FINAL_NORM_ROW + 1, 0:DMODEL]
    fb = p_ref[FINAL_NORM_ROW + 1:FINAL_NORM_ROW + 2, 0:DMODEL]
    out_ref[...] = _layernorm(x, fg, fb)
    # TODO(synk): dropout (train mode) and tgt/memory/key-padding masks are not modeled (eval / None path).


@jax.jit
def transformer_decoder(tgt, memory, query_pos, pos, packed):
    """tgt/query_pos: (S_t, B, D); memory/pos: (S_m, B, D); returns (1, S_t, B, D)."""
    s_t, b, d = tgt.shape
    s_m = memory.shape[0]
    nt, nm = s_t * b, s_m * b
    # layout-preserving flattens + one row-concat: a single activation operand for the kernel
    acts = jnp.concatenate(
        [tgt.reshape(nt, d), query_pos.reshape(nt, d),
         memory.reshape(nm, d), pos.reshape(nm, d)], axis=0).astype(jnp.float32)
    vmem = pl.BlockSpec(memory_space=pltpu.MemorySpace.VMEM)
    kernel = functools.partial(_decoder_kernel, nt=nt, nm=nm)
    out2d = pl.pallas_call(
        kernel,
        out_shape=jax.ShapeDtypeStruct((nt, d), jnp.float32),
        in_specs=[vmem, vmem],
        out_specs=vmem,
    )(acts, packed)
    return out2d.reshape(s_t, b, d)[None]              # matches output.unsqueeze(0)


# ----------------------------- parameter handling -----------------------------
def init_layer_params(key):
    ks = jax.random.split(key, 18)
    s = 0.1
    n = lambda i, shape: s * jax.random.normal(ks[i], shape, jnp.float32)
    return {
        "sa_in_w": n(0, (3 * DMODEL, DMODEL)), "sa_in_b": n(1, (3 * DMODEL,)),
        "sa_out_w": n(2, (DMODEL, DMODEL)), "sa_out_b": n(3, (DMODEL,)),
        "ca_in_w": n(4, (3 * DMODEL, DMODEL)), "ca_in_b": n(5, (3 * DMODEL,)),
        "ca_out_w": n(6, (DMODEL, DMODEL)), "ca_out_b": n(7, (DMODEL,)),
        "w1": n(8, (DIM_FF, DMODEL)), "b1": n(9, (DIM_FF,)),
        "w2": n(10, (DMODEL, DIM_FF)), "b2": n(11, (DMODEL,)),
        "ln1_g": 1.0 + n(12, (DMODEL,)), "ln1_b": n(13, (DMODEL,)),
        "ln2_g": 1.0 + n(14, (DMODEL,)), "ln2_b": n(15, (DMODEL,)),
        "ln3_g": 1.0 + n(16, (DMODEL,)), "ln3_b": n(17, (DMODEL,)),
    }


def pack_params(layer_params, final_g, final_b, s_t, s_m, batch):
    """Pack all decoder parameters + masks into one lane-padded (rows, 128) f32 slab."""
    nt, nm = s_t * batch, s_m * batch
    assert nt <= LANES and nm <= LANES, "masks are stored lane-wise; seq*batch must be <= 128"
    hq = NHEAD * nt
    rows = ((MASK_ROW0 + 3 * hq + 7) // 8) * 8
    slab = np.zeros((rows, LANES), np.float32)
    scale = 1.0 / math.sqrt(DHEAD)
    for l, p in enumerate(layer_params):
        p = {k: np.asarray(v, np.float32) for k, v in p.items()}
        base = l * LAYER_ROWS
        sa_in = p["sa_in_w"].T.copy()
        sa_in[:, :DMODEL] *= scale                       # fold softmax scale into Q columns
        ca_in = p["ca_in_w"].T.copy()
        ca_in[:, :DMODEL] *= scale
        slab[base + ROWS_W_SA:base + ROWS_W_SA + DMODEL, :3 * DMODEL] = sa_in
        slab[base + ROWS_WO_SA:base + ROWS_WO_SA + DMODEL, :DMODEL] = p["sa_out_w"].T
        slab[base + ROWS_W_CA:base + ROWS_W_CA + DMODEL, :3 * DMODEL] = ca_in
        slab[base + ROWS_WO_CA:base + ROWS_WO_CA + DMODEL, :DMODEL] = p["ca_out_w"].T
        slab[base + ROWS_W1:base + ROWS_W1 + DMODEL, :DIM_FF] = p["w1"].T
        slab[base + ROWS_W2:base + ROWS_W2 + DIM_FF, :DMODEL] = p["w2"].T
        vec = base + ROW_VEC
        sa_b = p["sa_in_b"].copy(); sa_b[:DMODEL] *= scale   # fold scale into Q bias too
        ca_b = p["ca_in_b"].copy(); ca_b[:DMODEL] *= scale
        slab[vec + V_BQKV_SA, :3 * DMODEL] = sa_b
        slab[vec + V_BO_SA, :DMODEL] = p["sa_out_b"]
        slab[vec + V_BQKV_CA, :3 * DMODEL] = ca_b
        slab[vec + V_BO_CA, :DMODEL] = p["ca_out_b"]
        slab[vec + V_B1, :DIM_FF] = p["b1"]
        slab[vec + V_B2, :DMODEL] = p["b2"]
        slab[vec + V_LN1G, :DMODEL] = p["ln1_g"]
        slab[vec + V_LN1B, :DMODEL] = p["ln1_b"]
        slab[vec + V_LN2G, :DMODEL] = p["ln2_g"]
        slab[vec + V_LN2B, :DMODEL] = p["ln2_b"]
        slab[vec + V_LN3G, :DMODEL] = p["ln3_g"]
        slab[vec + V_LN3B, :DMODEL] = p["ln3_b"]
    slab[FINAL_NORM_ROW, :DMODEL] = np.asarray(final_g, np.float32)
    slab[FINAL_NORM_ROW + 1, :DMODEL] = np.asarray(final_b, np.float32)

    # additive same-batch masks for flattened rows (row = s*batch + b), tiled over head blocks
    bq = np.arange(nt)[:, None] % batch
    self_m = np.where(bq == (np.arange(nt)[None, :] % batch), 0.0, -1e30).astype(np.float32)
    cross_m = np.where(bq == (np.arange(nm)[None, :] % batch), 0.0, -1e30).astype(np.float32)
    slab[MASK_ROW0:MASK_ROW0 + hq, :nt] = np.tile(self_m, (NHEAD, 1))
    slab[MASK_ROW0 + hq:MASK_ROW0 + 2 * hq, :nm] = np.tile(cross_m, (NHEAD, 1))
    # head block-diagonal lane mask: row r (head r//nt) keeps only its head's DHEAD lanes
    blk = ((np.arange(hq)[:, None] // nt) == (np.arange(DMODEL)[None, :] // DHEAD))
    slab[MASK_ROW0 + 2 * hq:MASK_ROW0 + 3 * hq, :DMODEL] = blk.astype(np.float32)
    return jnp.asarray(slab)


# ----------------------------- NumPy reference -----------------------------
def _ref_mha(q_in, k_in, v_in, w_in, b_in, w_out, b_out):
    """torch.nn.MultiheadAttention (batch_first=False, no mask, no dropout), seq-first inputs."""
    d = DMODEL
    q = q_in @ w_in[:d].T + b_in[:d]
    k = k_in @ w_in[d:2 * d].T + b_in[d:2 * d]
    v = v_in @ w_in[2 * d:].T + b_in[2 * d:]

    def heads(x):  # (S, B, D) -> (B, H, S, dh)
        s_, b_, _ = x.shape
        return x.transpose(1, 0, 2).reshape(b_, s_, NHEAD, DHEAD).transpose(0, 2, 1, 3)

    qh, kh, vh = heads(q), heads(k), heads(v)
    s = qh @ kh.transpose(0, 1, 3, 2) / math.sqrt(DHEAD)
    s = s - s.max(-1, keepdims=True)
    p = np.exp(s)
    p = p / p.sum(-1, keepdims=True)
    o = p @ vh                                             # (B, H, Sq, dh)
    o = o.transpose(2, 0, 1, 3).reshape(o.shape[2], o.shape[0], d)
    return o @ w_out.T + b_out


def reference(tgt, memory, query_pos, pos, layer_params, final_g, final_b):
    def ln(z, g, b):
        mu = z.mean(-1, keepdims=True)
        var = ((z - mu) ** 2).mean(-1, keepdims=True)
        return (z - mu) / np.sqrt(var + EPS) * g + b

    x = np.asarray(tgt, np.float32)
    memory = np.asarray(memory, np.float32)
    query_pos = np.asarray(query_pos, np.float32)
    pos = np.asarray(pos, np.float32)
    for p in layer_params:
        p = {k: np.asarray(v, np.float32) for k, v in p.items()}
        sa = _ref_mha(x + query_pos, x + query_pos, x,
                      p["sa_in_w"], p["sa_in_b"], p["sa_out_w"], p["sa_out_b"])
        x = ln(x + sa, p["ln1_g"], p["ln1_b"])
        ca = _ref_mha(x + query_pos, memory + pos, memory,
                      p["ca_in_w"], p["ca_in_b"], p["ca_out_w"], p["ca_out_b"])
        x = ln(x + ca, p["ln2_g"], p["ln2_b"])
        h = np.maximum(x @ p["w1"].T + p["b1"], 0.0)
        ff = h @ p["w2"].T + p["b2"]
        x = ln(x + ff, p["ln3_g"], p["ln3_b"])
    x = ln(x, np.asarray(final_g, np.float32), np.asarray(final_b, np.float32))
    return x[None]                                          # unsqueeze(0)


if __name__ == "__main__":
    root = jax.random.PRNGKey(0)
    keys = jax.random.split(root, NUM_LAYERS + 5)
    layer_params = [init_layer_params(keys[i]) for i in range(NUM_LAYERS)]
    final_g = 1.0 + 0.1 * jax.random.normal(keys[NUM_LAYERS], (DMODEL,), jnp.float32)
    final_b = 0.1 * jax.random.normal(keys[NUM_LAYERS + 1], (DMODEL,), jnp.float32)

    tgt = jax.random.normal(keys[NUM_LAYERS + 2], (SEQ_TGT, BATCH, DMODEL), jnp.float32)
    memory = jax.random.normal(keys[NUM_LAYERS + 3], (SEQ_MEM, BATCH, DMODEL), jnp.float32)
    kq, kp = jax.random.split(keys[NUM_LAYERS + 4])
    query_pos = 0.5 * jax.random.normal(kq, (SEQ_TGT, BATCH, DMODEL), jnp.float32)
    pos = 0.5 * jax.random.normal(kp, (SEQ_MEM, BATCH, DMODEL), jnp.float32)

    packed = pack_params(layer_params, final_g, final_b, SEQ_TGT, SEQ_MEM, BATCH)

    out = jax.block_until_ready(transformer_decoder(tgt, memory, query_pos, pos, packed))

    ref = reference(np.asarray(tgt), np.asarray(memory), np.asarray(query_pos),
                    np.asarray(pos), layer_params, final_g, final_b)
    np.testing.assert_allclose(np.asarray(out), ref, rtol=5e-3, atol=5e-3)
    assert out.shape == (1, SEQ_TGT, BATCH, DMODEL)
    print("KERNEL_OK")
</pallas_src>

<mosaic_0001>
module attributes {stable_mosaic.version = 11 : i64} {
  func.func @_decoder_kernel(%arg0: memref<64x32xf32, #tpu.memory_space<vmem>>, %arg1: memref<680x128xf32, #tpu.memory_space<vmem>>, %arg2: memref<16x32xf32, #tpu.memory_space<vmem>>) attributes {dimension_semantics = [], scalar_prefetch = 0 : i64, scratch_operands = 0 : i64, tpu.core_type = #tpu.core_type<tc>} {
    %c0 = arith.constant 0 : index
    %c0_0 = arith.constant 0 : index
    %0 = vector.load %arg0[%c0, %c0_0] : memref<64x32xf32, #tpu.memory_space<vmem>>, vector<64x32xf32>
    %1 = vector.extract_strided_slice %0 {offsets = [0, 0], sizes = [16, 32], strides = [1, 1]} : vector<64x32xf32> to vector<16x32xf32>
    %2 = vector.extract_strided_slice %0 {offsets = [16, 0], sizes = [16, 32], strides = [1, 1]} : vector<64x32xf32> to vector<16x32xf32>
    %3 = vector.extract_strided_slice %0 {offsets = [32, 0], sizes = [16, 32], strides = [1, 1]} : vector<64x32xf32> to vector<16x32xf32>
    %4 = vector.extract_strided_slice %0 {offsets = [48, 0], sizes = [16, 32], strides = [1, 1]} : vector<64x32xf32> to vector<16x32xf32>
    %5 = arith.addf %3, %4 : vector<16x32xf32>
    %c488 = arith.constant 488 : index
    %c0_1 = arith.constant 0 : index
    %6 = vector.load %arg1[%c488, %c0_1] : memref<680x128xf32, #tpu.memory_space<vmem>>, vector<64x16xf32>
    %c552 = arith.constant 552 : index
    %c0_2 = arith.constant 0 : index
    %7 = vector.load %arg1[%c552, %c0_2] : memref<680x128xf32, #tpu.memory_space<vmem>>, vector<64x16xf32>
    %c616 = arith.constant 616 : index
    %c0_3 = arith.constant 0 : index
    %8 = vector.load %arg1[%c616, %c0_3] : memref<680x128xf32, #tpu.memory_space<vmem>>, vector<64x32xf32>
    %c0_4 = arith.constant 0 : index
    %c0_5 = arith.constant 0 : index
    %9 = vector.load %arg1[%c0_4, %c0_5] : memref<680x128xf32, #tpu.memory_space<vmem>>, vector<32x128xf32>
    %c32 = arith.constant 32 : index
    %c0_6 = arith.constant 0 : index
    %10 = vector.load %arg1[%c32, %c0_6] : memref<680x128xf32, #tpu.memory_space<vmem>>, vector<32x128xf32>
    %c64 = arith.constant 64 : index
    %c0_7 = arith.constant 0 : index
    %11 = vector.load %arg1[%c64, %c0_7] : memref<680x128xf32, #tpu.memory_space<vmem>>, vector<32x128xf32>
    %c96 = arith.constant 96 : index
    %c0_8 = arith.constant 0 : index
    %12 = vector.load %arg1[%c96, %c0_8] : memref<680x128xf32, #tpu.memory_space<vmem>>, vector<32x128xf32>
    %c128 = arith.constant 128 : index
    %c0_9 = arith.constant 0 : index
    %13 = vector.load %arg1[%c128, %c0_9] : memref<680x128xf32, #tpu.memory_space<vmem>>, vector<32x128xf32>
    %c160 = arith.constant 160 : index
    %c0_10 = arith.constant 0 : index
    %14 = vector.load %arg1[%c160, %c0_10] : memref<680x128xf32, #tpu.memory_space<vmem>>, vector<64x128xf32>
    %c224 = arith.constant 224 : index
    %c0_11 = arith.constant 0 : index
    %15 = vector.load %arg1[%c224, %c0_11] : memref<680x128xf32, #tpu.memory_space<vmem>>, vector<16x128xf32>
    %16 = vector.extract_strided_slice %15 {offsets = [0, 0], sizes = [1, 128], strides = [1, 1]} : vector<16x128xf32> to vector<1x128xf32>
    %17 = vector.extract_strided_slice %15 {offsets = [1, 0], sizes = [1, 128], strides = [1, 1]} : vector<16x128xf32> to vector<1x128xf32>
    %18 = vector.extract_strided_slice %15 {offsets = [2, 0], sizes = [1, 128], strides = [1, 1]} : vector<16x128xf32> to vector<1x128xf32>
    %19 = vector.extract_strided_slice %15 {offsets = [3, 0], sizes = [1, 128], strides = [1, 1]} : vector<16x128xf32> to vector<1x128xf32>
    %20 = vector.extract_strided_slice %15 {offsets = [4, 0], sizes = [1, 128], strides = [1, 1]} : vector<16x128xf32> to vector<1x128xf32>
    %21 = vector.extract_strided_slice %15 {offsets = [5, 0], sizes = [1, 128], strides = [1, 1]} : vector<16x128xf32> to vector<1x128xf32>
    %22 = vector.extract_strided_slice %15 {offsets = [6, 0], sizes = [1, 32], strides = [1, 1]} : vector<16x128xf32> to vector<1x32xf32>
    %23 = vector.extract_strided_slice %15 {offsets = [7, 0], sizes = [1, 32], strides = [1, 1]} : vector<16x128xf32> to vector<1x32xf32>
    %24 = vector.extract_strided_slice %15 {offsets = [8, 0], sizes = [1, 32], strides = [1, 1]} : vector<16x128xf32> to vector<1x32xf32>
    %25 = vector.extract_strided_slice %15 {offsets = [9, 0], sizes = [1, 32], strides = [1, 1]} : vector<16x128xf32> to vector<1x32xf32>
    %26 = vector.extract_strided_slice %15 {offsets = [10, 0], sizes = [1, 32], strides = [1, 1]} : vector<16x128xf32> to vector<1x32xf32>
    %27 = vector.extract_strided_slice %15 {offsets = [11, 0], sizes = [1, 32], strides = [1, 1]} : vector<16x128xf32> to vector<1x32xf32>
    %28 = arith.addf %1, %2 : vector<16x32xf32>
    %29 = tpu.concatenate %28, %1 in 0 : vector<16x32xf32>, vector<16x32xf32> -> vector<32x32xf32>
    %cst = arith.constant dense<0.000000e+00> : vector<32x128xf32>
    %30 = tpu.matmul %29, %9, %cst {dimension_numbers = #tpu.dot_dimension_numbers<[1], [0], [0], [1], [0, 0, 1, 1], [], []>} : vector<32x32xf32>, vector<32x128xf32>, vector<32x128xf32> -> vector<32x128xf32>
    %31 = vector.broadcast %16 : vector<1x128xf32> to vector<32x128xf32>
    %32 = arith.addf %30, %31 : vector<32x128xf32>
    %33 = vector.extract_strided_slice %32 {offsets = [0, 0], sizes = [16, 32], strides = [1, 1]} : vector<32x128xf32> to vector<16x32xf32>
    %34 = vector.extract_strided_slice %32 {offsets = [0, 32], sizes = [16, 32], strides = [1, 1]} : vector<32x128xf32> to vector<16x32xf32>
    %35 = vector.extract_strided_slice %32 {offsets = [16, 64], sizes = [16, 32], strides = [1, 1]} : vector<32x128xf32> to vector<16x32xf32>
    %36 = tpu.concatenate %33, %33, %33, %33 in 0 : vector<16x32xf32>, vector<16x32xf32>, vector<16x32xf32>, vector<16x32xf32> -> vector<64x32xf32>
    %37 = arith.mulf %36, %8 : vector<64x32xf32>
    %cst_12 = arith.constant dense<0.000000e+00> : vector<64x16xf32>
    %38 = tpu.matmul %37, %34, %cst_12 {dimension_numbers = #tpu.dot_dimension_numbers<[1], [1], [0], [0], [0, 0, 1, 0], [], []>} : vector<64x32xf32>, vector<16x32xf32>, vector<64x16xf32> -> vector<64x16xf32>
    %39 = arith.addf %38, %6 : vector<64x16xf32>
    %cst_13 = arith.constant dense<0xFF800000> : vector<64xf32>
    %40 = vector.multi_reduction <maximumf>, %39, %cst_13 [1] : vector<64x16xf32> to vector<64xf32>
    %41 = vector.shape_cast %40 : vector<64xf32> to vector<64x1xf32>
    %42 = vector.broadcast %41 : vector<64x1xf32> to vector<64x16xf32>
    %43 = arith.subf %39, %42 : vector<64x16xf32>
    %44 = math.exp %43 : vector<64x16xf32>
    %cst_14 = arith.constant dense<0.000000e+00> : vector<64xf32>
    %45 = vector.multi_reduction <add>, %44, %cst_14 [1] : vector<64x16xf32> to vector<64xf32>
    %46 = vector.shape_cast %45 : vector<64xf32> to vector<64x1xf32>
    %47 = vector.broadcast %46 : vector<64x1xf32> to vector<64x16xf32>
    %48 = arith.divf %44, %47 : vector<64x16xf32>
    %cst_15 = arith.constant dense<0.000000e+00> : vector<64x32xf32>
    %49 = tpu.matmul %48, %35, %cst_15 {dimension_numbers = #tpu.dot_dimension_numbers<[1], [0], [0], [1], [0, 0, 1, 1], [], []>} : vector<64x16xf32>, vector<16x32xf32>, vector<64x32xf32> -> vector<64x32xf32>
    %50 = arith.mulf %49, %8 : vector<64x32xf32>
    %51 = vector.extract_strided_slice %50 {offsets = [0, 0], sizes = [16, 32], strides = [1, 1]} : vector<64x32xf32> to vector<16x32xf32>
    %52 = vector.extract_strided_slice %50 {offsets = [16, 0], sizes = [16, 32], strides = [1, 1]} : vector<64x32xf32> to vector<16x32xf32>
    %53 = arith.addf %51, %52 : vector<16x32xf32>
    %54 = vector.extract_strided_slice %50 {offsets = [32, 0], sizes = [16, 32], strides = [1, 1]} : vector<64x32xf32> to vector<16x32xf32>
    %55 = arith.addf %53, %54 : vector<16x32xf32>
    %56 = vector.extract_strided_slice %50 {offsets = [48, 0], sizes = [16, 32], strides = [1, 1]} : vector<64x32xf32> to vector<16x32xf32>
    %57 = arith.addf %55, %56 : vector<16x32xf32>
    %cst_16 = arith.constant dense<0.000000e+00> : vector<16x128xf32>
    %58 = tpu.matmul %57, %10, %cst_16 {dimension_numbers = #tpu.dot_dimension_numbers<[1], [0], [0], [1], [0, 0, 1, 1], [], []>} : vector<16x32xf32>, vector<32x128xf32>, vector<16x128xf32> -> vector<16x128xf32>
    %59 = vector.broadcast %17 : vector<1x128xf32> to vector<16x128xf32>
    %60 = arith.addf %58, %59 : vector<16x128xf32>
    %61 = vector.extract_strided_slice %60 {offsets = [0, 0], sizes = [16, 32], strides = [1, 1]} : vector<16x128xf32> to vector<16x32xf32>
    %62 = arith.addf %1, %61 : vector<16x32xf32>
    %cst_17 = arith.constant dense<0.000000e+00> : vector<16xf32>
    %63 = vector.multi_reduction <add>, %62, %cst_17 [1] : vector<16x32xf32> to vector<16xf32>
    %64 = vector.shape_cast %63 : vector<16xf32> to vector<16x1xf32>
    %cst_18 = arith.constant 3.200000e+01 : f32
    %65 = vector.broadcast %cst_18 : f32 to vector<16x1xf32>
    %66 = arith.divf %64, %65 : vector<16x1xf32>
    %67 = vector.broadcast %66 : vector<16x1xf32> to vector<16x32xf32>
    %68 = arith.subf %62, %67 : vector<16x32xf32>
    %69 = arith.mulf %68, %68 : vector<16x32xf32>
    %cst_19 = arith.constant dense<0.000000e+00> : vector<16xf32>
    %70 = vector.multi_reduction <add>, %69, %cst_19 [1] : vector<16x32xf32> to vector<16xf32>
    %71 = vector.shape_cast %70 : vector<16xf32> to vector<16x1xf32>
    %cst_20 = arith.constant 3.200000e+01 : f32
    %72 = vector.broadcast %cst_20 : f32 to vector<16x1xf32>
    %73 = arith.divf %71, %72 : vector<16x1xf32>
    %74 = vector.broadcast %66 : vector<16x1xf32> to vector<16x32xf32>
    %75 = arith.subf %62, %74 : vector<16x32xf32>
    %cst_21 = arith.constant 9.99999974E-6 : f32
    %76 = vector.broadcast %cst_21 : f32 to vector<16x1xf32>
    %77 = arith.addf %73, %76 : vector<16x1xf32>
    %78 = math.rsqrt %77 : vector<16x1xf32>
    %79 = vector.broadcast %78 : vector<16x1xf32> to vector<16x32xf32>
    %80 = arith.mulf %75, %79 : vector<16x32xf32>
    %81 = vector.broadcast %22 : vector<1x32xf32> to vector<16x32xf32>
    %82 = arith.mulf %80, %81 : vector<16x32xf32>
    %83 = vector.broadcast %23 : vector<1x32xf32> to vector<16x32xf32>
    %84 = arith.addf %82, %83 : vector<16x32xf32>
    %85 = arith.addf %84, %2 : vector<16x32xf32>
    %86 = tpu.concatenate %85, %5, %3 in 0 : vector<16x32xf32>, vector<16x32xf32>, vector<16x32xf32> -> vector<48x32xf32>
    %cst_22 = arith.constant dense<0.000000e+00> : vector<48x128xf32>
    %87 = tpu.matmul %86, %11, %cst_22 {dimension_numbers = #tpu.dot_dimension_numbers<[1], [0], [0], [1], [0, 0, 1, 1], [], []>} : vector<48x32xf32>, vector<32x128xf32>, vector<48x128xf32> -> vector<48x128xf32>
    %88 = vector.broadcast %18 : vector<1x128xf32> to vector<48x128xf32>
    %89 = arith.addf %87, %88 : vector<48x128xf32>
    %90 = vector.extract_strided_slice %89 {offsets = [0, 0], sizes = [16, 32], strides = [1, 1]} : vector<48x128xf32> to vector<16x32xf32>
    %91 = vector.extract_strided_slice %89 {offsets = [16, 32], sizes = [16, 32], strides = [1, 1]} : vector<48x128xf32> to vector<16x32xf32>
    %92 = vector.extract_strided_slice %89 {offsets = [32, 64], sizes = [16, 32], strides = [1, 1]} : vector<48x128xf32> to vector<16x32xf32>
    %93 = tpu.concatenate %90, %90, %90, %90 in 0 : vector<16x32xf32>, vector<16x32xf32>, vector<16x32xf32>, vector<16x32xf32> -> vector<64x32xf32>
    %94 = arith.mulf %93, %8 : vector<64x32xf32>
    %cst_23 = arith.constant dense<0.000000e+00> : vector<64x16xf32>
    %95 = tpu.matmul %94, %91, %cst_23 {dimension_numbers = #tpu.dot_dimension_numbers<[1], [1], [0], [0], [0, 0, 1, 0], [], []>} : vector<64x32xf32>, vector<16x32xf32>, vector<64x16xf32> -> vector<64x16xf32>
    %96 = arith.addf %95, %7 : vector<64x16xf32>
    %cst_24 = arith.constant dense<0xFF800000> : vector<64xf32>
    %97 = vector.multi_reduction <maximumf>, %96, %cst_24 [1] : vector<64x16xf32> to vector<64xf32>
    %98 = vector.shape_cast %97 : vector<64xf32> to vector<64x1xf32>
    %99 = vector.broadcast %98 : vector<64x1xf32> to vector<64x16xf32>
    %100 = arith.subf %96, %99 : vector<64x16xf32>
    %101 = math.exp %100 : vector<64x16xf32>
    %cst_25 = arith.constant dense<0.000000e+00> : vector<64xf32>
    %102 = vector.multi_reduction <add>, %101, %cst_25 [1] : vector<64x16xf32> to vector<64xf32>
    %103 = vector.shape_cast %102 : vector<64xf32> to vector<64x1xf32>
    %104 = vector.broadcast %103 : vector<64x1xf32> to vector<64x16xf32>
    %105 = arith.divf %101, %104 : vector<64x16xf32>
    %cst_26 = arith.constant dense<0.000000e+00> : vector<64x32xf32>
    %106 = tpu.matmul %105, %92, %cst_26 {dimension_numbers = #tpu.dot_dimension_numbers<[1], [0], [0], [1], [0, 0, 1, 1], [], []>} : vector<64x16xf32>, vector<16x32xf32>, vector<64x32xf32> -> vector<64x32xf32>
    %107 = arith.mulf %106, %8 : vector<64x32xf32>
    %108 = vector.extract_strided_slice %107 {offsets = [0, 0], sizes = [16, 32], strides = [1, 1]} : vector<64x32xf32> to vector<16x32xf32>
    %109 = vector.extract_strided_slice %107 {offsets = [16, 0], sizes = [16, 32], strides = [1, 1]} : vector<64x32xf32> to vector<16x32xf32>
    %110 = arith.addf %108, %109 : vector<16x32xf32>
    %111 = vector.extract_strided_slice %107 {offsets = [32, 0], sizes = [16, 32], strides = [1, 1]} : vector<64x32xf32> to vector<16x32xf32>
    %112 = arith.addf %110, %111 : vector<16x32xf32>
    %113 = vector.extract_strided_slice %107 {offsets = [48, 0], sizes = [16, 32], strides = [1, 1]} : vector<64x32xf32> to vector<16x32xf32>
    %114 = arith.addf %112, %113 : vector<16x32xf32>
    %cst_27 = arith.constant dense<0.000000e+00> : vector<16x128xf32>
    %115 = tpu.matmul %114, %12, %cst_27 {dimension_numbers = #tpu.dot_dimension_numbers<[1], [0], [0], [1], [0, 0, 1, 1], [], []>} : vector<16x32xf32>, vector<32x128xf32>, vector<16x128xf32> -> vector<16x128xf32>
    %116 = vector.broadcast %19 : vector<1x128xf32> to vector<16x128xf32>
    %117 = arith.addf %115, %116 : vector<16x128xf32>
    %118 = vector.extract_strided_slice %117 {offsets = [0, 0], sizes = [16, 32], strides = [1, 1]} : vector<16x128xf32> to vector<16x32xf32>
    %119 = arith.addf %84, %118 : vector<16x32xf32>
    %cst_28 = arith.constant dense<0.000000e+00> : vector<16xf32>
    %120 = vector.multi_reduction <add>, %119, %cst_28 [1] : vector<16x32xf32> to vector<16xf32>
    %121 = vector.shape_cast %120 : vector<16xf32> to vector<16x1xf32>
    %cst_29 = arith.constant 3.200000e+01 : f32
    %122 = vector.broadcast %cst_29 : f32 to vector<16x1xf32>
    %123 = arith.divf %121, %122 : vector<16x1xf32>
    %124 = vector.broadcast %123 : vector<16x1xf32> to vector<16x32xf32>
    %125 = arith.subf %119, %124 : vector<16x32xf32>
    %126 = arith.mulf %125, %125 : vector<16x32xf32>
    %cst_30 = arith.constant dense<0.000000e+00> : vector<16xf32>
    %127 = vector.multi_reduction <add>, %126, %cst_30 [1] : vector<16x32xf32> to vector<16xf32>
    %128 = vector.shape_cast %127 : vector<16xf32> to vector<16x1xf32>
    %cst_31 = arith.constant 3.200000e+01 : f32
    %129 = vector.broadcast %cst_31 : f32 to vector<16x1xf32>
    %130 = arith.divf %128, %129 : vector<16x1xf32>
    %131 = vector.broadcast %123 : vector<16x1xf32> to vector<16x32xf32>
    %132 = arith.subf %119, %131 : vector<16x32xf32>
    %cst_32 = arith.constant 9.99999974E-6 : f32
    %133 = vector.broadcast %cst_32 : f32 to vector<16x1xf32>
    %134 = arith.addf %130, %133 : vector<16x1xf32>
    %135 = math.rsqrt %134 : vector<16x1xf32>
    %136 = vector.broadcast %135 : vector<16x1xf32> to vector<16x32xf32>
    %137 = arith.mulf %132, %136 : vector<16x32xf32>
    %138 = vector.broadcast %24 : vector<1x32xf32> to vector<16x32xf32>
    %139 = arith.mulf %137, %138 : vector<16x32xf32>
    %140 = vector.broadcast %25 : vector<1x32xf32> to vector<16x32xf32>
    %141 = arith.addf %139, %140 : vector<16x32xf32>
    %cst_33 = arith.constant dense<0.000000e+00> : vector<16x128xf32>
    %142 = tpu.matmul %141, %13, %cst_33 {dimension_numbers = #tpu.dot_dimension_numbers<[1], [0], [0], [1], [0, 0, 1, 1], [], []>} : vector<16x32xf32>, vector<32x128xf32>, vector<16x128xf32> -> vector<16x128xf32>
    %143 = vector.broadcast %20 : vector<1x128xf32> to vector<16x128xf32>
    %144 = arith.addf %142, %143 : vector<16x128xf32>
    %cst_34 = arith.constant 0.000000e+00 : f32
    %145 = vector.broadcast %cst_34 : f32 to vector<16x128xf32>
    %146 = arith.maximumf %144, %145 : vector<16x128xf32>
    %147 = vector.extract_strided_slice %146 {offsets = [0, 0], sizes = [16, 64], strides = [1, 1]} : vector<16x128xf32> to vector<16x64xf32>
    %cst_35 = arith.constant dense<0.000000e+00> : vector<16x128xf32>
    %148 = tpu.matmul %147, %14, %cst_35 {dimension_numbers = #tpu.dot_dimension_numbers<[1], [0], [0], [1], [0, 0, 1, 1], [], []>} : vector<16x64xf32>, vector<64x128xf32>, vector<16x128xf32> -> vector<16x128xf32>
    %149 = vector.broadcast %21 : vector<1x128xf32> to vector<16x128xf32>
    %150 = arith.addf %148, %149 : vector<16x128xf32>
    %151 = vector.extract_strided_slice %150 {offsets = [0, 0], sizes = [16, 32], strides = [1, 1]} : vector<16x128xf32> to vector<16x32xf32>
    %152 = arith.addf %141, %151 : vector<16x32xf32>
    %cst_36 = arith.constant dense<0.000000e+00> : vector<16xf32>
    %153 = vector.multi_reduction <add>, %152, %cst_36 [1] : vector<16x32xf32> to vector<16xf32>
    %154 = vector.shape_cast %153 : vector<16xf32> to vector<16x1xf32>
    %cst_37 = arith.constant 3.200000e+01 : f32
    %155 = vector.broadcast %cst_37 : f32 to vector<16x1xf32>
    %156 = arith.divf %154, %155 : vector<16x1xf32>
    %157 = vector.broadcast %156 : vector<16x1xf32> to vector<16x32xf32>
    %158 = arith.subf %152, %157 : vector<16x32xf32>
    %159 = arith.mulf %158, %158 : vector<16x32xf32>
    %cst_38 = arith.constant dense<0.000000e+00> : vector<16xf32>
    %160 = vector.multi_reduction <add>, %159, %cst_38 [1] : vector<16x32xf32> to vector<16xf32>
    %161 = vector.shape_cast %160 : vector<16xf32> to vector<16x1xf32>
    %cst_39 = arith.constant 3.200000e+01 : f32
    %162 = vector.broadcast %cst_39 : f32 to vector<16x1xf32>
    %163 = arith.divf %161, %162 : vector<16x1xf32>
    %164 = vector.broadcast %156 : vector<16x1xf32> to vector<16x32xf32>
    %165 = arith.subf %152, %164 : vector<16x32xf32>
    %cst_40 = arith.constant 9.99999974E-6 : f32
    %166 = vector.broadcast %cst_40 : f32 to vector<16x1xf32>
    %167 = arith.addf %163, %166 : vector<16x1xf32>
    %168 = math.rsqrt %167 : vector<16x1xf32>
    %169 = vector.broadcast %168 : vector<16x1xf32> to vector<16x32xf32>
    %170 = arith.mulf %165, %169 : vector<16x32xf32>
    %171 = vector.broadcast %26 : vector<1x32xf32> to vector<16x32xf32>
    %172 = arith.mulf %170, %171 : vector<16x32xf32>
    %173 = vector.broadcast %27 : vector<1x32xf32> to vector<16x32xf32>
    %174 = arith.addf %172, %173 : vector<16x32xf32>
    %c240 = arith.constant 240 : index
    %c0_41 = arith.constant 0 : index
    %175 = vector.load %arg1[%c240, %c0_41] : memref<680x128xf32, #tpu.memory_space<vmem>>, vector<32x128xf32>
    %c272 = arith.constant 272 : index
    %c0_42 = arith.constant 0 : index
    %176 = vector.load %arg1[%c272, %c0_42] : memref<680x128xf32, #tpu.memory_space<vmem>>, vector<32x128xf32>
    %c304 = arith.constant 304 : index
    %c0_43 = arith.constant 0 : index
    %177 = vector.load %arg1[%c304, %c0_43] : memref<680x128xf32, #tpu.memory_space<vmem>>, vector<32x128xf32>
    %c336 = arith.constant 336 : index
    %c0_44 = arith.constant 0 : index
    %178 = vector.load %arg1[%c336, %c0_44] : memref<680x128xf32, #tpu.memory_space<vmem>>, vector<32x128xf32>
    %c368 = arith.constant 368 : index
    %c0_45 = arith.constant 0 : index
    %179 = vector.load %arg1[%c368, %c0_45] : memref<680x128xf32, #tpu.memory_space<vmem>>, vector<32x128xf32>
    %c400 = arith.constant 400 : index
    %c0_46 = arith.constant 0 : index
    %180 = vector.load %arg1[%c400, %c0_46] : memref<680x128xf32, #tpu.memory_space<vmem>>, vector<64x128xf32>
    %c464 = arith.constant 464 : index
    %c0_47 = arith.constant 0 : index
    %181 = vector.load %arg1[%c464, %c0_47] : memref<680x128xf32, #tpu.memory_space<vmem>>, vector<16x128xf32>
    %182 = vector.extract_strided_slice %181 {offsets = [0, 0], sizes = [1, 128], strides = [1, 1]} : vector<16x128xf32> to vector<1x128xf32>
    %183 = vector.extract_strided_slice %181 {offsets = [1, 0], sizes = [1, 128], strides = [1, 1]} : vector<16x128xf32> to vector<1x128xf32>
    %184 = vector.extract_strided_slice %181 {offsets = [2, 0], sizes = [1, 128], strides = [1, 1]} : vector<16x128xf32> to vector<1x128xf32>
    %185 = vector.extract_strided_slice %181 {offsets = [3, 0], sizes = [1, 128], strides = [1, 1]} : vector<16x128xf32> to vector<1x128xf32>
    %186 = vector.extract_strided_slice %181 {offsets = [4, 0], sizes = [1, 128], strides = [1, 1]} : vector<16x128xf32> to vector<1x128xf32>
    %187 = vector.extract_strided_slice %181 {offsets = [5, 0], sizes = [1, 128], strides = [1, 1]} : vector<16x128xf32> to vector<1x128xf32>
    %188 = vector.extract_strided_slice %181 {offsets = [6, 0], sizes = [1, 32], strides = [1, 1]} : vector<16x128xf32> to vector<1x32xf32>
    %189 = vector.extract_strided_slice %181 {offsets = [7, 0], sizes = [1, 32], strides = [1, 1]} : vector<16x128xf32> to vector<1x32xf32>
    %190 = vector.extract_strided_slice %181 {offsets = [8, 0], sizes = [1, 32], strides = [1, 1]} : vector<16x128xf32> to vector<1x32xf32>
    %191 = vector.extract_strided_slice %181 {offsets = [9, 0], sizes = [1, 32], strides = [1, 1]} : vector<16x128xf32> to vector<1x32xf32>
    %192 = vector.extract_strided_slice %181 {offsets = [10, 0], sizes = [1, 32], strides = [1, 1]} : vector<16x128xf32> to vector<1x32xf32>
    %193 = vector.extract_strided_slice %181 {offsets = [11, 0], sizes = [1, 32], strides = [1, 1]} : vector<16x128xf32> to vector<1x32xf32>
    %194 = arith.addf %174, %2 : vector<16x32xf32>
    %195 = tpu.concatenate %194, %174 in 0 : vector<16x32xf32>, vector<16x32xf32> -> vector<32x32xf32>
    %cst_48 = arith.constant dense<0.000000e+00> : vector<32x128xf32>
    %196 = tpu.matmul %195, %175, %cst_48 {dimension_numbers = #tpu.dot_dimension_numbers<[1], [0], [0], [1], [0, 0, 1, 1], [], []>} : vector<32x32xf32>, vector<32x128xf32>, vector<32x128xf32> -> vector<32x128xf32>
    %197 = vector.broadcast %182 : vector<1x128xf32> to vector<32x128xf32>
    %198 = arith.addf %196, %197 : vector<32x128xf32>
    %199 = vector.extract_strided_slice %198 {offsets = [0, 0], sizes = [16, 32], strides = [1, 1]} : vector<32x128xf32> to vector<16x32xf32>
    %200 = vector.extract_strided_slice %198 {offsets = [0, 32], sizes = [16, 32], strides = [1, 1]} : vector<32x128xf32> to vector<16x32xf32>
    %201 = vector.extract_strided_slice %198 {offsets = [16, 64], sizes = [16, 32], strides = [1, 1]} : vector<32x128xf32> to vector<16x32xf32>
    %202 = tpu.concatenate %199, %199, %199, %199 in 0 : vector<16x32xf32>, vector<16x32xf32>, vector<16x32xf32>, vector<16x32xf32> -> vector<64x32xf32>
    %203 = arith.mulf %202, %8 : vector<64x32xf32>
    %cst_49 = arith.constant dense<0.000000e+00> : vector<64x16xf32>
    %204 = tpu.matmul %203, %200, %cst_49 {dimension_numbers = #tpu.dot_dimension_numbers<[1], [1], [0], [0], [0, 0, 1, 0], [], []>} : vector<64x32xf32>, vector<16x32xf32>, vector<64x16xf32> -> vector<64x16xf32>
    %205 = arith.addf %204, %6 : vector<64x16xf32>
    %cst_50 = arith.constant dense<0xFF800000> : vector<64xf32>
    %206 = vector.multi_reduction <maximumf>, %205, %cst_50 [1] : vector<64x16xf32> to vector<64xf32>
    %207 = vector.shape_cast %206 : vector<64xf32> to vector<64x1xf32>
    %208 = vector.broadcast %207 : vector<64x1xf32> to vector<64x16xf32>
    %209 = arith.subf %205, %208 : vector<64x16xf32>
    %210 = math.exp %209 : vector<64x16xf32>
    %cst_51 = arith.constant dense<0.000000e+00> : vector<64xf32>
    %211 = vector.multi_reduction <add>, %210, %cst_51 [1] : vector<64x16xf32> to vector<64xf32>
    %212 = vector.shape_cast %211 : vector<64xf32> to vector<64x1xf32>
    %213 = vector.broadcast %212 : vector<64x1xf32> to vector<64x16xf32>
    %214 = arith.divf %210, %213 : vector<64x16xf32>
    %cst_52 = arith.constant dense<0.000000e+00> : vector<64x32xf32>
    %215 = tpu.matmul %214, %201, %cst_52 {dimension_numbers = #tpu.dot_dimension_numbers<[1], [0], [0], [1], [0, 0, 1, 1], [], []>} : vector<64x16xf32>, vector<16x32xf32>, vector<64x32xf32> -> vector<64x32xf32>
    %216 = arith.mulf %215, %8 : vector<64x32xf32>
    %217 = vector.extract_strided_slice %216 {offsets = [0, 0], sizes = [16, 32], strides = [1, 1]} : vector<64x32xf32> to vector<16x32xf32>
    %218 = vector.extract_strided_slice %216 {offsets = [16, 0], sizes = [16, 32], strides = [1, 1]} : vector<64x32xf32> to vector<16x32xf32>
    %219 = arith.addf %217, %218 : vector<16x32xf32>
    %220 = vector.extract_strided_slice %216 {offsets = [32, 0], sizes = [16, 32], strides = [1, 1]} : vector<64x32xf32> to vector<16x32xf32>
    %221 = arith.addf %219, %220 : vector<16x32xf32>
    %222 = vector.extract_strided_slice %216 {offsets = [48, 0], sizes = [16, 32], strides = [1, 1]} : vector<64x32xf32> to vector<16x32xf32>
    %223 = arith.addf %221, %222 : vector<16x32xf32>
    %cst_53 = arith.constant dense<0.000000e+00> : vector<16x128xf32>
    %224 = tpu.matmul %223, %176, %cst_53 {dimension_numbers = #tpu.dot_dimension_numbers<[1], [0], [0], [1], [0, 0, 1, 1], [], []>} : vector<16x32xf32>, vector<32x128xf32>, vector<16x128xf32> -> vector<16x128xf32>
    %225 = vector.broadcast %183 : vector<1x128xf32> to vector<16x128xf32>
    %226 = arith.addf %224, %225 : vector<16x128xf32>
    %227 = vector.extract_strided_slice %226 {offsets = [0, 0], sizes = [16, 32], strides = [1, 1]} : vector<16x128xf32> to vector<16x32xf32>
    %228 = arith.addf %174, %227 : vector<16x32xf32>
    %cst_54 = arith.constant dense<0.000000e+00> : vector<16xf32>
    %229 = vector.multi_reduction <add>, %228, %cst_54 [1] : vector<16x32xf32> to vector<16xf32>
    %230 = vector.shape_cast %229 : vector<16xf32> to vector<16x1xf32>
    %cst_55 = arith.constant 3.200000e+01 : f32
    %231 = vector.broadcast %cst_55 : f32 to vector<16x1xf32>
    %232 = arith.divf %230, %231 : vector<16x1xf32>
    %233 = vector.broadcast %232 : vector<16x1xf32> to vector<16x32xf32>
    %234 = arith.subf %228, %233 : vector<16x32xf32>
    %235 = arith.mulf %234, %234 : vector<16x32xf32>
    %cst_56 = arith.constant dense<0.000000e+00> : vector<16xf32>
    %236 = vector.multi_reduction <add>, %235, %cst_56 [1] : vector<16x32xf32> to vector<16xf32>
    %237 = vector.shape_cast %236 : vector<16xf32> to vector<16x1xf32>
    %cst_57 = arith.constant 3.200000e+01 : f32
    %238 = vector.broadcast %cst_57 : f32 to vector<16x1xf32>
    %239 = arith.divf %237, %238 : vector<16x1xf32>
    %240 = vector.broadcast %232 : vector<16x1xf32> to vector<16x32xf32>
    %241 = arith.subf %228, %240 : vector<16x32xf32>
    %cst_58 = arith.constant 9.99999974E-6 : f32
    %242 = vector.broadcast %cst_58 : f32 to vector<16x1xf32>
    %243 = arith.addf %239, %242 : vector<16x1xf32>
    %244 = math.rsqrt %243 : vector<16x1xf32>
    %245 = vector.broadcast %244 : vector<16x1xf32> to vector<16x32xf32>
    %246 = arith.mulf %241, %245 : vector<16x32xf32>
    %247 = vector.broadcast %188 : vector<1x32xf32> to vector<16x32xf32>
    %248 = arith.mulf %246, %247 : vector<16x32xf32>
    %249 = vector.broadcast %189 : vector<1x32xf32> to vector<16x32xf32>
    %250 = arith.addf %248, %249 : vector<16x32xf32>
    %251 = arith.addf %250, %2 : vector<16x32xf32>
    %252 = tpu.concatenate %251, %5, %3 in 0 : vector<16x32xf32>, vector<16x32xf32>, vector<16x32xf32> -> vector<48x32xf32>
    %cst_59 = arith.constant dense<0.000000e+00> : vector<48x128xf32>
    %253 = tpu.matmul %252, %177, %cst_59 {dimension_numbers = #tpu.dot_dimension_numbers<[1], [0], [0], [1], [0, 0, 1, 1], [], []>} : vector<48x32xf32>, vector<32x128xf32>, vector<48x128xf32> -> vector<48x128xf32>
    %254 = vector.broadcast %184 : vector<1x128xf32> to vector<48x128xf32>
    %255 = arith.addf %253, %254 : vector<48x128xf32>
    %256 = vector.extract_strided_slice %255 {offsets = [0, 0], sizes = [16, 32], strides = [1, 1]} : vector<48x128xf32> to vector<16x32xf32>
    %257 = vector.extract_strided_slice %255 {offsets = [16, 32], sizes = [16, 32], strides = [1, 1]} : vector<48x128xf32> to vector<16x32xf32>
    %258 = vector.extract_strided_slice %255 {offsets = [32, 64], sizes = [16, 32], strides = [1, 1]} : vector<48x128xf32> to vector<16x32xf32>
    %259 = tpu.concatenate %256, %256, %256, %256 in 0 : vector<16x32xf32>, vector<16x32xf32>, vector<16x32xf32>, vector<16x32xf32> -> vector<64x32xf32>
    %260 = arith.mulf %259, %8 : vector<64x32xf32>
    %cst_60 = arith.constant dense<0.000000e+00> : vector<64x16xf32>
    %261 = tpu.matmul %260, %257, %cst_60 {dimension_numbers = #tpu.dot_dimension_numbers<[1], [1], [0], [0], [0, 0, 1, 0], [], []>} : vector<64x32xf32>, vector<16x32xf32>, vector<64x16xf32> -> vector<64x16xf32>
    %262 = arith.addf %261, %7 : vector<64x16xf32>
    %cst_61 = arith.constant dense<0xFF800000> : vector<64xf32>
    %263 = vector.multi_reduction <maximumf>, %262, %cst_61 [1] : vector<64x16xf32> to vector<64xf32>
    %264 = vector.shape_cast %263 : vector<64xf32> to vector<64x1xf32>
    %265 = vector.broadcast %264 : vector<64x1xf32> to vector<64x16xf32>
    %266 = arith.subf %262, %265 : vector<64x16xf32>
    %267 = math.exp %266 : vector<64x16xf32>
    %cst_62 = arith.constant dense<0.000000e+00> : vector<64xf32>
    %268 = vector.multi_reduction <add>, %267, %cst_62 [1] : vector<64x16xf32> to vector<64xf32>
    %269 = vector.shape_cast %268 : vector<64xf32> to vector<64x1xf32>
    %270 = vector.broadcast %269 : vector<64x1xf32> to vector<64x16xf32>
    %271 = arith.divf %267, %270 : vector<64x16xf32>
    %cst_63 = arith.constant dense<0.000000e+00> : vector<64x32xf32>
    %272 = tpu.matmul %271, %258, %cst_63 {dimension_numbers = #tpu.dot_dimension_numbers<[1], [0], [0], [1], [0, 0, 1, 1], [], []>} : vector<64x16xf32>, vector<16x32xf32>, vector<64x32xf32> -> vector<64x32xf32>
    %273 = arith.mulf %272, %8 : vector<64x32xf32>
    %274 = vector.extract_strided_slice %273 {offsets = [0, 0], sizes = [16, 32], strides = [1, 1]} : vector<64x32xf32> to vector<16x32xf32>
    %275 = vector.extract_strided_slice %273 {offsets = [16, 0], sizes = [16, 32], strides = [1, 1]} : vector<64x32xf32> to vector<16x32xf32>
    %276 = arith.addf %274, %275 : vector<16x32xf32>
    %277 = vector.extract_strided_slice %273 {offsets = [32, 0], sizes = [16, 32], strides = [1, 1]} : vector<64x32xf32> to vector<16x32xf32>
    %278 = arith.addf %276, %277 : vector<16x32xf32>
    %279 = vector.extract_strided_slice %273 {offsets = [48, 0], sizes = [16, 32], strides = [1, 1]} : vector<64x32xf32> to vector<16x32xf32>
    %280 = arith.addf %278, %279 : vector<16x32xf32>
    %cst_64 = arith.constant dense<0.000000e+00> : vector<16x128xf32>
    %281 = tpu.matmul %280, %178, %cst_64 {dimension_numbers = #tpu.dot_dimension_numbers<[1], [0], [0], [1], [0, 0, 1, 1], [], []>} : vector<16x32xf32>, vector<32x128xf32>, vector<16x128xf32> -> vector<16x128xf32>
    %282 = vector.broadcast %185 : vector<1x128xf32> to vector<16x128xf32>
    %283 = arith.addf %281, %282 : vector<16x128xf32>
    %284 = vector.extract_strided_slice %283 {offsets = [0, 0], sizes = [16, 32], strides = [1, 1]} : vector<16x128xf32> to vector<16x32xf32>
    %285 = arith.addf %250, %284 : vector<16x32xf32>
    %cst_65 = arith.constant dense<0.000000e+00> : vector<16xf32>
    %286 = vector.multi_reduction <add>, %285, %cst_65 [1] : vector<16x32xf32> to vector<16xf32>
    %287 = vector.shape_cast %286 : vector<16xf32> to vector<16x1xf32>
    %cst_66 = arith.constant 3.200000e+01 : f32
    %288 = vector.broadcast %cst_66 : f32 to vector<16x1xf32>
    %289 = arith.divf %287, %288 : vector<16x1xf32>
    %290 = vector.broadcast %289 : vector<16x1xf32> to vector<16x32xf32>
    %291 = arith.subf %285, %290 : vector<16x32xf32>
    %292 = arith.mulf %291, %291 : vector<16x32xf32>
    %cst_67 = arith.constant dense<0.000000e+00> : vector<16xf32>
    %293 = vector.multi_reduction <add>, %292, %cst_67 [1] : vector<16x32xf32> to vector<16xf32>
    %294 = vector.shape_cast %293 : vector<16xf32> to vector<16x1xf32>
    %cst_68 = arith.constant 3.200000e+01 : f32
    %295 = vector.broadcast %cst_68 : f32 to vector<16x1xf32>
    %296 = arith.divf %294, %295 : vector<16x1xf32>
    %297 = vector.broadcast %289 : vector<16x1xf32> to vector<16x32xf32>
    %298 = arith.subf %285, %297 : vector<16x32xf32>
    %cst_69 = arith.constant 9.99999974E-6 : f32
    %299 = vector.broadcast %cst_69 : f32 to vector<16x1xf32>
    %300 = arith.addf %296, %299 : vector<16x1xf32>
    %301 = math.rsqrt %300 : vector<16x1xf32>
    %302 = vector.broadcast %301 : vector<16x1xf32> to vector<16x32xf32>
    %303 = arith.mulf %298, %302 : vector<16x32xf32>
    %304 = vector.broadcast %190 : vector<1x32xf32> to vector<16x32xf32>
    %305 = arith.mulf %303, %304 : vector<16x32xf32>
    %306 = vector.broadcast %191 : vector<1x32xf32> to vector<16x32xf32>
    %307 = arith.addf %305, %306 : vector<16x32xf32>
    %cst_70 = arith.constant dense<0.000000e+00> : vector<16x128xf32>
    %308 = tpu.matmul %307, %179, %cst_70 {dimension_numbers = #tpu.dot_dimension_numbers<[1], [0], [0], [1], [0, 0, 1, 1], [], []>} : vector<16x32xf32>, vector<32x128xf32>, vector<16x128xf32> -> vector<16x128xf32>
    %309 = vector.broadcast %186 : vector<1x128xf32> to vector<16x128xf32>
    %310 = arith.addf %308, %309 : vector<16x128xf32>
    %cst_71 = arith.constant 0.000000e+00 : f32
    %311 = vector.broadcast %cst_71 : f32 to vector<16x128xf32>
    %312 = arith.maximumf %310, %311 : vector<16x128xf32>
    %313 = vector.extract_strided_slice %312 {offsets = [0, 0], sizes = [16, 64], strides = [1, 1]} : vector<16x128xf32> to vector<16x64xf32>
    %cst_72 = arith.constant dense<0.000000e+00> : vector<16x128xf32>
    %314 = tpu.matmul %313, %180, %cst_72 {dimension_numbers = #tpu.dot_dimension_numbers<[1], [0], [0], [1], [0, 0, 1, 1], [], []>} : vector<16x64xf32>, vector<64x128xf32>, vector<16x128xf32> -> vector<16x128xf32>
    %315 = vector.broadcast %187 : vector<1x128xf32> to vector<16x128xf32>
    %316 = arith.addf %314, %315 : vector<16x128xf32>
    %317 = vector.extract_strided_slice %316 {offsets = [0, 0], sizes = [16, 32], strides = [1, 1]} : vector<16x128xf32> to vector<16x32xf32>
    %318 = arith.addf %307, %317 : vector<16x32xf32>
    %cst_73 = arith.constant dense<0.000000e+00> : vector<16xf32>
    %319 = vector.multi_reduction <add>, %318, %cst_73 [1] : vector<16x32xf32> to vector<16xf32>
    %320 = vector.shape_cast %319 : vector<16xf32> to vector<16x1xf32>
    %cst_74 = arith.constant 3.200000e+01 : f32
    %321 = vector.broadcast %cst_74 : f32 to vector<16x1xf32>
    %322 = arith.divf %320, %321 : vector<16x1xf32>
    %323 = vector.broadcast %322 : vector<16x1xf32> to vector<16x32xf32>
    %324 = arith.subf %318, %323 : vector<16x32xf32>
    %325 = arith.mulf %324, %324 : vector<16x32xf32>
    %cst_75 = arith.constant dense<0.000000e+00> : vector<16xf32>
    %326 = vector.multi_reduction <add>, %325, %cst_75 [1] : vector<16x32xf32> to vector<16xf32>
    %327 = vector.shape_cast %326 : vector<16xf32> to vector<16x1xf32>
    %cst_76 = arith.constant 3.200000e+01 : f32
    %328 = vector.broadcast %cst_76 : f32 to vector<16x1xf32>
    %329 = arith.divf %327, %328 : vector<16x1xf32>
    %330 = vector.broadcast %322 : vector<16x1xf32> to vector<16x32xf32>
    %331 = arith.subf %318, %330 : vector<16x32xf32>
    %cst_77 = arith.constant 9.99999974E-6 : f32
    %332 = vector.broadcast %cst_77 : f32 to vector<16x1xf32>
    %333 = arith.addf %329, %332 : vector<16x1xf32>
    %334 = math.rsqrt %333 : vector<16x1xf32>
    %335 = vector.broadcast %334 : vector<16x1xf32> to vector<16x32xf32>
    %336 = arith.mulf %331, %335 : vector<16x32xf32>
    %337 = vector.broadcast %192 : vector<1x32xf32> to vector<16x32xf32>
    %338 = arith.mulf %336, %337 : vector<16x32xf32>
    %339 = vector.broadcast %193 : vector<1x32xf32> to vector<16x32xf32>
    %340 = arith.addf %338, %339 : vector<16x32xf32>
    %c480 = arith.constant 480 : index
    %c0_78 = arith.constant 0 : index
    %341 = vector.load %arg1[%c480, %c0_78] : memref<680x128xf32, #tpu.memory_space<vmem>>, vector<1x32xf32>
    %c481 = arith.constant 481 : index
    %c0_79 = arith.constant 0 : index
    %342 = vector.load %arg1[%c481, %c0_79] : memref<680x128xf32, #tpu.memory_space<vmem>>, vector<1x32xf32>
    %cst_80 = arith.constant dense<0.000000e+00> : vector<16xf32>
    %343 = vector.multi_reduction <add>, %340, %cst_80 [1] : vector<16x32xf32> to vector<16xf32>
    %344 = vector.shape_cast %343 : vector<16xf32> to vector<16x1xf32>
    %cst_81 = arith.constant 3.200000e+01 : f32
    %345 = vector.broadcast %cst_81 : f32 to vector<16x1xf32>
    %346 = arith.divf %344, %345 : vector<16x1xf32>
    %347 = vector.broadcast %346 : vector<16x1xf32> to vector<16x32xf32>
    %348 = arith.subf %340, %347 : vector<16x32xf32>
    %349 = arith.mulf %348, %348 : vector<16x32xf32>
    %cst_82 = arith.constant dense<0.000000e+00> : vector<16xf32>
    %350 = vector.multi_reduction <add>, %349, %cst_82 [1] : vector<16x32xf32> to vector<16xf32>
    %351 = vector.shape_cast %350 : vector<16xf32> to vector<16x1xf32>
    %cst_83 = arith.constant 3.200000e+01 : f32
    %352 = vector.broadcast %cst_83 : f32 to vector<16x1xf32>
    %353 = arith.divf %351, %352 : vector<16x1xf32>
    %354 = vector.broadcast %346 : vector<16x1xf32> to vector<16x32xf32>
    %355 = arith.subf %340, %354 : vector<16x32xf32>
    %cst_84 = arith.constant 9.99999974E-6 : f32
    %356 = vector.broadcast %cst_84 : f32 to vector<16x1xf32>
    %357 = arith.addf %353, %356 : vector<16x1xf32>
    %358 = math.rsqrt %357 : vector<16x1xf32>
    %359 = vector.broadcast %358 : vector<16x1xf32> to vector<16x32xf32>
    %360 = arith.mulf %355, %359 : vector<16x32xf32>
    %361 = vector.broadcast %341 : vector<1x32xf32> to vector<16x32xf32>
    %362 = arith.mulf %360, %361 : vector<16x32xf32>
    %363 = vector.broadcast %342 : vector<1x32xf32> to vector<16x32xf32>
    %364 = arith.addf %362, %363 : vector<16x32xf32>
    %c0_85 = arith.constant 0 : index
    %c0_86 = arith.constant 0 : index
    %365 = vector.load %arg2[%c0_85, %c0_86] : memref<16x32xf32, #tpu.memory_space<vmem>>, vector<16x32xf32>
    tpu.vector_store %arg2[%c0_85, %c0_86], %364 {strides = array<i32>} : memref<16x32xf32, #tpu.memory_space<vmem>>, vector<16x32xf32>,
    return
  }
}

</mosaic_0001>

<bundles_post_ra>
// kernel: transformer_decoder.1
= control target key start
LH: loop header
LB: loop body
LE: loop exit
PB: predicated region body
PF: predicated region fallthrough
CT: control target
= control target key end

     0   :  { %7 = vsyncpa [#allocation3], 0  ;;  %s4460_s0 = inlined_call_operand.vmem [shape: f32[64,32], index: 0, kind: input, shape index: {}]   ;;  %s4461_s1 = inlined_call_operand.hbm [shape: f32[680,128], index: 1, kind: input, shape index: {}]   ;;  %s4462_s2 = inlined_call_operand.hbm [shape: f32[16,32], index: 2, kind: output, shape index: {}]  }
   0x1   :  { %8 = vsyncpa [#allocation4], 0  ;;  %s3895_s9 = smov [#allocation2]  }
   0x2   :  { %s16_s10 = sshll.u32 %s3895_s9, 4  ;;  %s17_s10 = int_to_ptr.vmem [resolvable:$true] %s16_s10 }
   0x3   :  { %s3859_s11 = scalar_lea.vmem %s17_s10, 10880  ;;  %p3864_p1 = scmp.lt.s32.totalorder %s17_s10, %s17_s10 }
   0x4   :  { %p3860_p0 = scmp.ne.s32.totalorder %s17_s10, %s3859_s11  ;;  %p3865_p2 = scmp.lt.s32.totalorder %s3859_s11, %s3859_s11 }
   0x6   :  { %p3866_p3 = por %p3865_p2, %p3864_p1 }
   0x8   :  { %p3867_p4 = pnand %p3866_p3, %p3860_p0 }
   0xa   :  { %3870 = shalt.err (!%p3867_p4)
}
   0xb   :  { %s3896_s12 = smov 128   ;;  %s3897_s13 = smov 8  }
   0xc   :  { %22 = dma.hbm_to_vmem [thread:$0]  %s4461_s1, 10880, %s17_s10, [#allocation3], %s3896_s12, %s3896_s12, %s3897_s13  }
   0xd   :  { %3891 = dma.done.wait [#allocation3], 10880  }
   0xe   :  { %3892 = vsyncadd [#allocation3], 4294956416  ;;  %v63_v0 = vld [vmem:[#allocation2 + $0x18] sm:$0xff]  ;;  %v62_v1 = vld [vmem:[#allocation2 + $0x10] sm:$0xff]  ;;  %vm96_vm0 = vcmask 261120   ;;  %v92_v10 = vlaneseq  ;;  %s3898_s23 = smov 96  }
   0xf   :  { %3365 = vmatprep.subr.mxu0 %v63_v0  ;;  %v3925_v2 = vld [vmem:[%s4460_s0] sm:$0xff]  ;;  %v3930_v3 = vld [vmem:[%s4460_s0 + $0x10] sm:$0xff]  ;;  %v61_v4 = vld [vmem:[#allocation2 + $0x8] sm:$0xff]  ;;  %vm341_vm1 = vcmask 130048   ;;  %s3899_s24 = smov 64   ;;  %vm1428_vm2 = vcmask 523264  }
  0x10   :  { %3366 = vmatpush3.msra.mxu0 %v63_v0  ;;  %v90_v5 = vadd.f32 %v3930_v3, %v3925_v2  ;;  %v3937_v6 = vld [vmem:[%s4460_s0 + $0x8] sm:$0xff]  ;;  %v3942_v7 = vld [vmem:[%s4460_s0 + $0x18] sm:$0xff]  ;;  %v60_v8 = vld [vmem:[#allocation2] sm:$0xff]  ;;  %v3952_v11 = vshrl.u32 %v92_v10, 7 }
  0x11   :  { %3367 = vmatprep.subr.mxu0 %v62_v1  ;;  %v91_v9 = vadd.f32 %v3942_v7, %v3937_v6  ;;  %v3957_v13 = vld [vmem:[#allocation2 + $0xe0] sm:$0xff]  ;;  %v3964_v18 = vld [vmem:[#allocation2 + $0x268] sm:$0xff]  ;;  %v3973_v23 = vld [vmem:[#allocation2 + $0x270] sm:$0xff] }
  0x12   :  { %3368 = vmatpush3.msra.mxu0 %v62_v1  ;;  %3373 = vmatprep.mubr.msk.f32.mxu0 %vm96_vm0, %v90_v5  ;;  %v3955_v12 = vsub.s32 0, %v3952_v11  ;;  %v3976_v24 = vld [vmem:[#allocation2 + $0x278] sm:$0xff]  ;;  %v3981_v27 = vld [vmem:[#allocation2 + $0x280] sm:$0xff]  ;;  %v3984_v28 = vld [vmem:[#allocation2 + $0x288] sm:$0xff] }
  0x13   :  { %3369 = vmatprep.subr.mxu0 %v61_v4  ;;  %v3989_v31 = vld [vmem:[#allocation2 + $0x290] sm:$0xff]  ;;  %v3992_v32 = vld [vmem:[#allocation2 + $0x298] sm:$0xff]  ;;  %v3997_v35 = vld [vmem:[#allocation2 + $0x2a0] sm:$0xff] }
  0x14   :  { %3370 = vmatpush3.msra.mxu0 %v61_v4  ;;  %v3961_v14 = vrot.slane %v3957_v13, %v3955_v12  ;;  %v37_v37 = vld [vmem:[#allocation2 + $0x1f0] sm:$0xff]  ;;  %v36_v39 = vld [vmem:[#allocation2 + $0x1e8] sm:$0xff]  ;;  %v39_v44 = vld [vmem:[#allocation2 + $0x200] sm:$0xff] }
  0x15   :  { %3371 = vmatprep.subr.mxu0 %v60_v8  ;;  %v38_v46 = vld [vmem:[#allocation2 + $0x1f8] sm:$0xff]  ;;  %v41_v51 = vld [vmem:[#allocation2 + $0x210] sm:$0xff]  ;;  %v40_v57 = vld [vmem:[#allocation2 + $0x208] sm:$0xff] }
  0x16   :  { %3372 = vmatpush3.msra.mxu0 %v60_v8  ;;  %v42_v62 = vld [vmem:[#allocation2 + $0x218] sm:$0xff]  ;;  %v43_v1 = vld [vmem:[#allocation2 + $0x220] sm:$0xff] }
  0x17   :  { %3374 = vmatmul.mubr.msk.f32.vlgmr.msra.gmra.mxu0 %vm96_vm0, %v91_v9 }
  0x18   :  { %3376 = vmatprep.mubr.msk.f32.mxu0 %vm96_vm0, %v3925_v2 }
  0x1b   :  { %3377 = vmatmul.mubr.msk.f32.gmra.mxu0 %vm96_vm0, %v3937_v6 }
  0xd7   :  { %v3375_v15 = vpop.f32.mrf.mxu0 }
  0xd8   :  { %v181_v16 = vadd.f32 %v3375_v15, %v3961_v14 }
  0xd9   :  { %v175_v17 = vpop.f32.mrf.mxu0 }
  0xda   :  { %v176_v19 = vadd.f32 %v175_v17, %v3961_v14  ;;  %206 = vrot.lane.b32.xlu0 %v181_v16, %s3898_s23  ;;  %v195_v25 = vmul.f32 %v181_v16, %v3973_v23  ;;  %v197_v29 = vmul.f32 %v181_v16, %v3981_v27  ;;  %v199_v33 = vmul.f32 %v181_v16, %v3989_v31 }
  0xdb   :  { %v201_v36 = vmul.f32 %v181_v16, %v3997_v35 }
  0xdc   :  { %v194_v20 = vmul.f32 %v176_v19, %v3964_v18  ;;  %v196_v26 = vmul.f32 %v176_v19, %v3976_v24  ;;  %v198_v30 = vmul.f32 %v176_v19, %v3984_v28  ;;  %v200_v34 = vmul.f32 %v176_v19, %v3992_v32 }
  0xde   :  { %204 = vrot.lane.b32.xlu0 %v176_v19, %s3898_s23  ;;  %3383 = vmatprep.mubr.msk.f32.mxu1 %vm96_vm0, %v194_v20 }
 0x14c   :  { %v207_v21 = vpop.permute.xlu0 %206 }
 0x14d   :  { %3379 = vmatprep.subr.msk.mxu1 %vm96_vm0, %v207_v21 }
 0x14e   :  { %3380 = vmatpush3.xpose.msk.msra.mxu1 %vm96_vm0, %v207_v21 }
 0x150   :  { %v205_v22 = vpop.permute.xlu0 %204 }
 0x151   :  { %3381 = vmatprep.subr.msk.mxu1 %vm96_vm0, %v205_v22 }
 0x152   :  { %3382 = vmatpush3.xpose.msk.msra.mxu1 %vm96_vm0, %v205_v22 }
 0x155   :  { %3384 = vmatmul.mubr.msk.f32.vlgmr.msra.gmra.mxu1 %vm96_vm0, %v195_v25 }
 0x156   :  { %3386 = vmatprep.mubr.msk.f32.mxu1 %vm96_vm0, %v196_v26 }
 0x159   :  { %3387 = vmatmul.mubr.msk.f32.gmra.mxu1 %vm96_vm0, %v197_v29 }
 0x15a   :  { %3389 = vmatprep.mubr.msk.f32.mxu1 %vm96_vm0, %v198_v30 }
 0x15d   :  { %3390 = vmatmul.mubr.msk.f32.gmra.mxu1 %vm96_vm0, %v199_v33 }
 0x15e   :  { %3392 = vmatprep.mubr.msk.f32.mxu1 %vm96_vm0, %v200_v34 }
 0x161   :  { %3393 = vmatmul.mubr.msk.f32.gmra.mxu1 %vm96_vm0, %v201_v36 }
 0x215   :  { %v3385_v38 = vpop.f32.mrf.mxu1 }
 0x216   :  { %v308_v40 = vadd.f32 %v3385_v38, %v37_v37 }
 0x217   :  { %v302_v41 = vpop.f32.mrf.mxu1 }
 0x218   :  { %v303_v42 = vadd.f32 %v302_v41, %v36_v39  ;;  %v345_v43 = vsel %vm341_vm1, %v308_v40, -inf }
 0x219   :  { %346 = vmax.xlane.f32.xlu1 %v345_v43  ;;  %v3388_v45 = vpop.f32.mrf.mxu1 }
 0x21a   :  { %v318_v48 = vadd.f32 %v3388_v45, %v39_v44  ;;  %v342_v50 = vsel %vm341_vm1, %v303_v42, -inf }
 0x21b   :  { %v312_v47 = vpop.f32.mrf.mxu1 }
 0x21c   :  { %v313_v49 = vadd.f32 %v312_v47, %v38_v46  ;;  %v351_v56 = vsel %vm341_vm1, %v318_v48, -inf }
 0x21d   :  { %v3391_v52 = vpop.f32.mrf.mxu1  ;;  %343 = vmax.xlane.f32.xlu1 %v342_v50 }
 0x21e   :  { %v348_v53 = vsel %vm341_vm1, %v313_v49, -inf  ;;  %v328_v55 = vadd.f32 %v3391_v52, %v41_v51 }
 0x21f   :  { %v322_v54 = vpop.f32.mrf.mxu1  ;;  %349 = vmax.xlane.f32.xlu0 %v348_v53 }
 0x220   :  { %v323_v59 = vadd.f32 %v322_v54, %v40_v57  ;;  %v357_v60 = vsel %vm341_vm1, %v328_v55, -inf }
 0x221   :  { %v3394_v58 = vpop.f32.mrf.mxu1  ;;  %352 = vmax.xlane.f32.xlu1 %v351_v56 }
 0x222   :  { %v354_v0 = vsel %vm341_vm1, %v323_v59, -inf  ;;  %v338_v4 = vadd.f32 %v3394_v58, %v43_v1 }
 0x223   :  { %v332_v61 = vpop.f32.mrf.mxu1 }
 0x224   :  { %v333_v63 = vadd.f32 %v332_v61, %v42_v62  ;;  %v363_v8 = vsel %vm341_vm1, %v338_v4, -inf  ;;  %v3378_v61 = vpop.f32.mrf.mxu0 }
 0x225   :  { %358 = vmax.xlane.f32.xlu1 %v357_v60  ;;  %v191_v62 = vadd.f32 %v3378_v61, %v3961_v14 }
 0x226   :  { %v360_v5 = vsel %vm341_vm1, %v333_v63, -inf }
 0x229   :  { %355 = vmax.xlane.f32.xlu1 %v354_v0 }
 0x22d   :  { %361 = vmax.xlane.f32.xlu1 %v360_v5 }
 0x231   :  { %364 = vmax.xlane.f32.xlu1 %v363_v8 }
 0x2a2   :  { %v347_v9 = vpop.xlane.xlu1 %346 }
 0x2a3   :  { %v367_v10 = vsub.f32 %v308_v40, %v347_v9 }
 0x2a5   :  { %v376_v15 = vmul.f32 1.442695, %v367_v10 }
 0x2a6   :  { %v344_v16 = vpop.xlane.xlu1 %343 }
 0x2a7   :  { %3665 = vpow2.f32 %v376_v15  ;;  %v366_v17 = vsub.f32 %v303_v42, %v344_v16 }
 0x2a8   :  { %v350_v19 = vpop.xlane.xlu0 %349 }
 0x2a9   :  { %v374_v20 = vmul.f32 1.442695, %v366_v17  ;;  %v368_v21 = vsub.f32 %v313_v49, %v350_v19 }
 0x2aa   :  { %v353_v22 = vpop.xlane.xlu1 %352 }
 0x2ab   :  { %3667 = vpow2.f32 %v374_v20  ;;  %v378_v25 = vmul.f32 1.442695, %v368_v21  ;;  %v369_v26 = vsub.f32 %v318_v48, %v353_v22 }
 0x2ad   :  { %3669 = vpow2.f32 %v378_v25  ;;  %v380_v29 = vmul.f32 1.442695, %v369_v26 }
 0x2ae   :  { %v359_v30 = vpop.xlane.xlu1 %358 }
 0x2af   :  { %3671 = vpow2.f32 %v380_v29  ;;  %v371_v33 = vsub.f32 %v328_v55, %v359_v30 }
 0x2b1   :  { %v384_v34 = vmul.f32 1.442695, %v371_v33 }
 0x2b2   :  { %v356_v36 = vpop.xlane.xlu1 %355 }
 0x2b3   :  { %3673 = vpow2.f32 %v384_v34  ;;  %v370_v37 = vsub.f32 %v323_v59, %v356_v36 }
 0x2b4   :  { %v4011_v38 = vpop.eup %3665 }
 0x2b5   :  { %v382_v39 = vmul.f32 1.442695, %v370_v37  ;;  %v393_v40 = vsel %vm341_vm1, %v4011_v38, 0.0 }
 0x2b6   :  { %394 = vadd.xlane.f32.xlu1 %v393_v40  ;;  %v362_v41 = vpop.xlane.xlu1 %361 }
 0x2b7   :  { %3675 = vpow2.f32 %v382_v39  ;;  %v372_v42 = vsub.f32 %v333_v63, %v362_v41  ;;  %v185_v63 = vpop.f32.mrf.mxu0 }
 0x2b8   :  { %v3668_v43 = vpop.eup %3667  ;;  %v186_v0 = vadd.f32 %v185_v63, %v3961_v14 }
 0x2b9   :  { %v386_v44 = vmul.f32 1.442695, %v372_v42  ;;  %v390_v45 = vsel %vm341_vm1, %v3668_v43, 0.0  ;;  %v67_v42 = vld [vmem:[#allocation2 + $0x38] sm:$0xff] }
 0x2ba   :  { %v3670_v46 = vpop.eup %3669  ;;  %391 = vadd.xlane.f32.xlu1 %v390_v45  ;;  %v365_v47 = vpop.xlane.xlu1 %364  ;;  %3411 = vmatprep.subr.mxu1 %v67_v42  ;;  %v64_v45 = vld [vmem:[#allocation2 + $0x20] sm:$0xff] }
 0x2bb   :  { %3677 = vpow2.f32 %v386_v44  ;;  %v373_v48 = vsub.f32 %v338_v4, %v365_v47  ;;  %v396_v51 = vsel %vm341_vm1, %v3670_v46, 0.0  ;;  %3412 = vmatpush3.msra.mxu1 %v67_v42  ;;  %v65_v44 = vld [vmem:[#allocation2 + $0x28] sm:$0xff] }
 0x2bc   :  { %v3672_v49 = vpop.eup %3671 }
 0x2bd   :  { %v388_v50 = vmul.f32 1.442695, %v373_v48  ;;  %v399_v52 = vsel %vm341_vm1, %v3672_v49, 0.0 }
 0x2be   :  { %397 = vadd.xlane.f32.xlu1 %v396_v51  ;;  %400 = vadd.xlane.f32.xlu0 %v399_v52 }
 0x2bf   :  { %3679 = vpow2.f32 %v388_v50 }
 0x2c0   :  { %v3674_v53 = vpop.eup %3673 }
 0x2c1   :  { %v405_v54 = vsel %vm341_vm1, %v3674_v53, 0.0 }
 0x2c2   :  { %406 = vadd.xlane.f32.xlu0 %v405_v54 }
 0x2c4   :  { %v3676_v55 = vpop.eup %3675 }
 0x2c5   :  { %v402_v56 = vsel %vm341_vm1, %v3676_v55, 0.0 }
 0x2c6   :  { %403 = vadd.xlane.f32.xlu1 %v402_v56 }
 0x2c8   :  { %v3678_v57 = vpop.eup %3677 }
 0x2c9   :  { %v408_v58 = vsel %vm341_vm1, %v3678_v57, 0.0 }
 0x2ca   :  { %409 = vadd.xlane.f32.xlu1 %v408_v58 }
 0x2cc   :  { %v3680_v59 = vpop.eup %3679 }
 0x2cd   :  { %v411_v60 = vsel %vm341_vm1, %v3680_v59, 0.0 }
 0x2ce   :  { %412 = vadd.xlane.f32.xlu0 %v411_v60 }
 0x2db   :  { %434 = vrot.lane.b32.xlu1 %v191_v62, %s3899_s24 }
 0x2e4   :  { %432 = vrot.lane.b32.xlu0 %v186_v0, %s3899_s24 }
 0x33f   :  { %v395_v1 = vpop.xlane.xlu1 %394 }
 0x343   :  { %v392_v4 = vpop.xlane.xlu1 %391 }
 0x344   :  { %3681 = vrcp.f32 %v392_v4 }
 0x345   :  { %3683 = vrcp.f32 %v395_v1 }
 0x347   :  { %v398_v5 = vpop.xlane.xlu1 %397  ;;  %v401_v8 = vpop.xlane.xlu0 %400 }
 0x348   :  { %3685 = vrcp.f32 %v398_v5 }
 0x349   :  { %3687 = vrcp.f32 %v401_v8  ;;  %v4046_v8 = vsub.s32 1, %v3952_v11 }
 0x34b   :  { %v407_v15 = vpop.xlane.xlu0 %406 }
 0x34f   :  { %v404_v9 = vpop.xlane.xlu1 %403 }
 0x350   :  { %3689 = vrcp.f32 %v404_v9  ;;  %v584_v9 = vrot.slane %v3957_v13, %v4046_v8 }
 0x351   :  { %v3682_v10 = vpop.eup %3681  ;;  %3691 = vrcp.f32 %v407_v15 }
 0x352   :  { %v415_v16 = vmul.f32 %v3682_v10, %v3668_v43  ;;  %v3684_v20 = vpop.eup %3683  ;;  %v66_v43 = vld [vmem:[#allocation2 + $0x30] sm:$0xff] }
 0x353   :  { %v410_v17 = vpop.xlane.xlu1 %409  ;;  %v417_v25 = vmul.f32 %v3684_v20, %v4011_v38  ;;  %3413 = vmatprep.subr.mxu1 %v66_v43 }
 0x354   :  { %3399 = vmatprep.mubr.msk.f32.mxu0 %vm341_vm1, %v415_v16  ;;  %3693 = vrcp.f32 %v410_v17  ;;  %3414 = vmatpush3.msra.mxu1 %v66_v43 }
 0x355   :  { %v3686_v21 = vpop.eup %3685  ;;  %3415 = vmatprep.subr.mxu1 %v65_v44 }
 0x356   :  { %v3688_v26 = vpop.eup %3687  ;;  %v419_v29 = vmul.f32 %v3686_v21, %v3670_v46  ;;  %3416 = vmatpush3.msra.mxu1 %v65_v44 }
 0x357   :  { %v413_v14 = vpop.xlane.xlu0 %412  ;;  %v435_v19 = vpop.permute.xlu1 %434  ;;  %v421_v33 = vmul.f32 %v3688_v26, %v3672_v49  ;;  %3417 = vmatprep.subr.mxu1 %v64_v45 }
 0x358   :  { %3695 = vrcp.f32 %v413_v14  ;;  %3395 = vmatprep.subr.mxu0 %v435_v19  ;;  %3418 = vmatpush3.msra.mxu1 %v64_v45 }
 0x359   :  { %3396 = vmatpush3.msra.mxu0 %v435_v19 }
 0x35b   :  { %v433_v22 = vpop.permute.xlu0 %432 }
 0x35c   :  { %3397 = vmatprep.subr.mxu0 %v433_v22 }
 0x35d   :  { %3398 = vmatpush3.msra.mxu0 %v433_v22  ;;  %v3690_v30 = vpop.eup %3689 }
 0x35e   :  { %3400 = vmatmul.mubr.msk.f32.vlgmr.msra.gmra.mxu0 %vm341_vm1, %v417_v25  ;;  %v3692_v34 = vpop.eup %3691  ;;  %v423_v36 = vmul.f32 %v3690_v30, %v3676_v55 }
 0x35f   :  { %3402 = vmatprep.mubr.msk.f32.mxu0 %vm341_vm1, %v419_v29  ;;  %v425_v39 = vmul.f32 %v3692_v34, %v3674_v53 }
 0x361   :  { %v3694_v37 = vpop.eup %3693 }
 0x362   :  { %3403 = vmatmul.mubr.msk.f32.gmra.mxu0 %vm341_vm1, %v421_v33  ;;  %v427_v38 = vmul.f32 %v3694_v37, %v3678_v57 }
 0x363   :  { %3405 = vmatprep.mubr.msk.f32.mxu0 %vm341_vm1, %v423_v36 }
 0x365   :  { %v3696_v40 = vpop.eup %3695 }
 0x366   :  { %3406 = vmatmul.mubr.msk.f32.gmra.mxu0 %vm341_vm1, %v425_v39  ;;  %v429_v41 = vmul.f32 %v3696_v40, %v3680_v59  ;;  %v71_v39 = vld [vmem:[#allocation2 + $0x58] sm:$0xff]  ;;  %v69_v40 = vld [vmem:[#allocation2 + $0x48] sm:$0xff] }
 0x367   :  { %3408 = vmatprep.mubr.msk.f32.mxu0 %vm341_vm1, %v427_v38  ;;  %3422 = vmatprep.subr.mxu0 %v71_v39  ;;  %v68_v38 = vld [vmem:[#allocation2 + $0x40] sm:$0xff] }
 0x368   :  { %3423 = vmatpush3.msra.mxu0 %v71_v39 }
 0x36a   :  { %3409 = vmatmul.mubr.msk.f32.gmra.mxu0 %vm341_vm1, %v429_v41 }
 0x41e   :  { %v3401_v46 = vpop.f32.mrf.mxu0 }
 0x41f   :  { %v568_v56 = vmul.f32 %v3401_v46, %v3973_v23 }
 0x420   :  { %v528_v47 = vpop.f32.mrf.mxu0 }
 0x421   :  { %v567_v54 = vmul.f32 %v528_v47, %v3964_v18  ;;  %v697_v47 = vsub.s32 6, %v3952_v11 }
 0x422   :  { %v3404_v48 = vpop.f32.mrf.mxu0 }
 0x423   :  { %v570_v52 = vmul.f32 %v3404_v48, %v3981_v27  ;;  %v703_v48 = vsub.s32 7, %v3952_v11 }
 0x424   :  { %v538_v49 = vpop.f32.mrf.mxu0 }
 0x425   :  { %v569_v51 = vmul.f32 %v538_v49, %v3976_v24  ;;  %v576_v60 = vadd.f32 %v570_v52, %v568_v56  ;;  %v698_v49 = vrot.slane %v3957_v13, %v697_v47 }
 0x426   :  { %v3407_v50 = vpop.f32.mrf.mxu0 }
 0x427   :  { %v572_v57 = vmul.f32 %v3407_v50, %v3989_v31  ;;  %v575_v59 = vadd.f32 %v569_v51, %v567_v54 }
 0x428   :  { %v548_v53 = vpop.f32.mrf.mxu0 }
 0x429   :  { %v571_v55 = vmul.f32 %v548_v53, %v3984_v28  ;;  %v578_v1 = vadd.f32 %v576_v60, %v572_v57  ;;  %v704_v53 = vrot.slane %v3957_v13, %v703_v48 }
 0x42a   :  { %v3410_v58 = vpop.f32.mrf.mxu0 }
 0x42b   :  { %v574_v61 = vmul.f32 %v3410_v58, %v3997_v35  ;;  %v577_v63 = vadd.f32 %v575_v59, %v571_v55  ;;  %v30_v58 = vld [vmem:[%s4460_s0 + $0x20] sm:$0xff]  ;;  %v32_v59 = vld [vmem:[%s4460_s0 + $0x30] sm:$0xff] }
 0x42c   :  { %v558_v62 = vpop.f32.mrf.mxu0 }
 0x42d   :  { %v573_v0 = vmul.f32 %v558_v62, %v3992_v32  ;;  %v580_v5 = vadd.f32 %v578_v1, %v574_v61  ;;  %v4076_v62 = vadd.f32 %v32_v59, %v30_v58 }
 0x42f   :  { %v579_v4 = vadd.f32 %v577_v63, %v573_v0  ;;  %v31_v63 = vld [vmem:[%s4460_s0 + $0x28] sm:$0xff]  ;;  %v33_v0 = vld [vmem:[%s4460_s0 + $0x38] sm:$0xff] }
 0x431   :  { %3419 = vmatprep.mubr.msk.f32.mxu1 %vm96_vm0, %v579_v4  ;;  %v4088_v4 = vadd.f32 %v33_v0, %v31_v63  ;;  %v50_v0 = vld [vmem:[#allocation2 + $0x258] sm:$0xff] }
 0x432   :  { %3420 = vmatmul.mubr.msk.f32.vlgmr.msra.gmra.mxu1 %vm96_vm0, %v580_v5 }
 0x4f2   :  { %v3421_v10 = vpop.f32.mrf.mxu1 }
 0x4f3   :  { %v663_v15 = vadd.f32 %v3421_v10, %v584_v9 }
 0x4f4   :  { %v657_v16 = vpop.f32.mrf.mxu1 }
 0x4f5   :  { %v658_v17 = vadd.f32 %v657_v16, %v584_v9  ;;  %v667_v14 = vadd.f32 %v663_v15, %v3937_v6 }
 0x4f7   :  { %v671_v19 = vsel %vm96_vm0, %v667_v14, 0.0  ;;  %v666_v20 = vadd.f32 %v658_v17, %v3925_v2  ;;  %v70_v2 = vld [vmem:[#allocation2 + $0x50] sm:$0xff] }
 0x4f8   :  { %672 = vadd.xlane.f32.xlu0 %v671_v19  ;;  %3424 = vmatprep.subr.mxu0 %v70_v2 }
 0x4f9   :  { %v668_v21 = vsel %vm96_vm0, %v666_v20, 0.0  ;;  %3425 = vmatpush3.msra.mxu0 %v70_v2 }
 0x4fa   :  { %669 = vadd.xlane.f32.xlu1 %v668_v21  ;;  %3426 = vmatprep.subr.mxu0 %v69_v40 }
 0x4fb   :  { %3427 = vmatpush3.msra.mxu0 %v69_v40  ;;  %v47_v40 = vld [vmem:[#allocation2 + $0x240] sm:$0xff] }
 0x4fc   :  { %3428 = vmatprep.subr.mxu0 %v68_v38 }
 0x4fd   :  { %3429 = vmatpush3.msra.mxu0 %v68_v38 }
 0x581   :  { %v673_v22 = vpop.xlane.xlu0 %672 }
 0x582   :  { %v676_v25 = vmul.f32 0.03125, %v673_v22 }
 0x583   :  { %v670_v26 = vpop.xlane.xlu1 %669 }
 0x584   :  { %v678_v29 = vsub.f32 %v667_v14, %v676_v25  ;;  %v675_v30 = vmul.f32 0.03125, %v670_v26 }
 0x586   :  { %v677_v33 = vsub.f32 %v666_v20, %v675_v30  ;;  %v680_v34 = vmul.f32 %v678_v29, %v678_v29 }
 0x588   :  { %v684_v36 = vsel %vm96_vm0, %v680_v34, 0.0  ;;  %v679_v37 = vmul.f32 %v677_v33, %v677_v33 }
 0x589   :  { %685 = vadd.xlane.f32.xlu0 %v684_v36  ;;  %v45_v36 = vld [vmem:[#allocation2 + $0x230] sm:$0xff] }
 0x58a   :  { %v681_v6 = vsel %vm96_vm0, %v679_v37, 0.0 }
 0x58b   :  { %682 = vadd.xlane.f32.xlu1 %v681_v6  ;;  %v44_v6 = vld [vmem:[#allocation2 + $0x228] sm:$0xff] }
 0x612   :  { %v686_v41 = vpop.xlane.xlu0 %685 }
 0x613   :  { %v688_v42 = vmul.f32 0.03125, %v686_v41 }
 0x614   :  { %v683_v43 = vpop.xlane.xlu1 %682 }
 0x615   :  { %v690_v44 = vadd.f32 1e-05, %v688_v42  ;;  %v687_v45 = vmul.f32 0.03125, %v683_v43  ;;  %v46_v43 = vld [vmem:[#allocation2 + $0x238] sm:$0xff] }
 0x617   :  { %3697 = vrsqrt.f32 %v690_v44  ;;  %v689_v46 = vadd.f32 1e-05, %v687_v45 }
 0x619   :  { %3699 = vrsqrt.f32 %v689_v46 }
 0x624   :  { %v3698_v50 = vpop.eup %3697 }
 0x625   :  { %v694_v51 = vmul.f32 %v3698_v50, %v678_v29 }
 0x626   :  { %v3700_v52 = vpop.eup %3699 }
 0x627   :  { %v693_v54 = vmul.f32 %v3700_v52, %v677_v33  ;;  %v700_v55 = vmul.f32 %v698_v49, %v694_v51 }
 0x629   :  { %v699_v56 = vmul.f32 %v698_v49, %v693_v54  ;;  %v4064_v57 = vadd.f32 %v704_v53, %v700_v55  ;;  %v49_v49 = vld [vmem:[#allocation2 + $0x250] sm:$0xff] }
 0x62b   :  { %v4072_v60 = vadd.f32 %v704_v53, %v699_v56  ;;  %v708_v1 = vadd.f32 %v4064_v57, %v3942_v7  ;;  %v48_v53 = vld [vmem:[#allocation2 + $0x248] sm:$0xff] }
 0x62d   :  { %v707_v61 = vadd.f32 %v4072_v60, %v3930_v3  ;;  %v4097_v3 = vsub.s32 2, %v3952_v11 }
 0x62f   :  { %3430 = vmatprep.mubr.msk.f32.mxu0 %vm96_vm0, %v707_v61  ;;  %v4101_v5 = vrot.slane %v3957_v13, %v4097_v3 }
 0x630   :  { %3431 = vmatmul.mubr.msk.f32.vlgmr.msra.gmra.mxu0 %vm96_vm0, %v708_v1 }
 0x631   :  { %3433 = vmatprep.mubr.msk.f32.mxu0 %vm96_vm0, %v4076_v62 }
 0x634   :  { %3434 = vmatmul.mubr.msk.f32.gmra.mxu0 %vm96_vm0, %v4088_v4 }
 0x635   :  { %3436 = vmatprep.mubr.msk.f32.mxu0 %vm96_vm0, %v30_v58  ;;  %v51_v58 = vld [vmem:[#allocation2 + $0x260] sm:$0xff] }
 0x638   :  { %3437 = vmatmul.mubr.msk.f32.gmra.mxu0 %vm96_vm0, %v31_v63 }
 0x6f0   :  { %v3432_v7 = vpop.f32.mrf.mxu0 }
 0x6f1   :  { %v803_v21 = vadd.f32 %v3432_v7, %v4101_v5 }
 0x6f2   :  { %v797_v9 = vpop.f32.mrf.mxu0 }
 0x6f3   :  { %v798_v10 = vadd.f32 %v797_v9, %v4101_v5  ;;  %v827_v22 = vmul.f32 %v803_v21, %v3973_v23  ;;  %v829_v26 = vmul.f32 %v803_v21, %v3981_v27  ;;  %v831_v30 = vmul.f32 %v803_v21, %v3989_v31 }
 0x6f4   :  { %v3435_v15 = vpop.f32.mrf.mxu0  ;;  %v833_v34 = vmul.f32 %v803_v21, %v3997_v35 }
 0x6f5   :  { %v813_v16 = vadd.f32 %v3435_v15, %v4101_v5  ;;  %v826_v17 = vmul.f32 %v798_v10, %v3964_v18  ;;  %v828_v25 = vmul.f32 %v798_v10, %v3976_v24  ;;  %v830_v29 = vmul.f32 %v798_v10, %v3984_v28 }
 0x6f6   :  { %v807_v14 = vpop.f32.mrf.mxu0  ;;  %v832_v33 = vmul.f32 %v798_v10, %v3992_v32 }
 0x6f7   :  { %v808_v19 = vadd.f32 %v807_v14, %v4101_v5  ;;  %838 = vrot.lane.b32.xlu1 %v813_v16, %s3898_s23  ;;  %3443 = vmatprep.mubr.msk.f32.mxu1 %vm96_vm0, %v826_v17 }
 0x6f9   :  { %836 = vrot.lane.b32.xlu0 %v808_v19, %s3898_s23 }
 0x769   :  { %v839_v20 = vpop.permute.xlu1 %838 }
 0x76a   :  { %3439 = vmatprep.subr.msk.mxu1 %vm96_vm0, %v839_v20 }
 0x76b   :  { %3440 = vmatpush3.xpose.msk.msra.mxu1 %vm96_vm0, %v839_v20  ;;  %v837_v13 = vpop.permute.xlu0 %836 }
 0x76c   :  { %3441 = vmatprep.subr.msk.mxu1 %vm96_vm0, %v837_v13 }
 0x76f   :  { %3442 = vmatpush3.xpose.msk.msra.mxu1 %vm96_vm0, %v837_v13 }
 0x772   :  { %3444 = vmatmul.mubr.msk.f32.vlgmr.msra.gmra.mxu1 %vm96_vm0, %v827_v22 }
 0x773   :  { %3446 = vmatprep.mubr.msk.f32.mxu1 %vm96_vm0, %v828_v25 }
 0x776   :  { %3447 = vmatmul.mubr.msk.f32.gmra.mxu1 %vm96_vm0, %v829_v26 }
 0x777   :  { %3449 = vmatprep.mubr.msk.f32.mxu1 %vm96_vm0, %v830_v29 }
 0x77a   :  { %3450 = vmatmul.mubr.msk.f32.gmra.mxu1 %vm96_vm0, %v831_v30 }
 0x77b   :  { %3452 = vmatprep.mubr.msk.f32.mxu1 %vm96_vm0, %v832_v33 }
 0x77e   :  { %3453 = vmatmul.mubr.msk.f32.gmra.mxu1 %vm96_vm0, %v833_v34 }
 0x832   :  { %v3445_v37 = vpop.f32.mrf.mxu1 }
 0x833   :  { %v940_v39 = vadd.f32 %v3445_v37, %v45_v36 }
 0x834   :  { %v934_v2 = vpop.f32.mrf.mxu1 }
 0x835   :  { %v935_v38 = vadd.f32 %v934_v2, %v44_v6  ;;  %v976_v41 = vsel %vm341_vm1, %v940_v39, -inf }
 0x836   :  { %977 = vmax.xlane.f32.xlu0 %v976_v41  ;;  %v3448_v42 = vpop.f32.mrf.mxu1 }
 0x837   :  { %v950_v44 = vadd.f32 %v3448_v42, %v47_v40  ;;  %v973_v45 = vsel %vm341_vm1, %v935_v38, -inf }
 0x838   :  { %v944_v46 = vpop.f32.mrf.mxu1  ;;  %974 = vmax.xlane.f32.xlu1 %v973_v45 }
 0x839   :  { %v945_v50 = vadd.f32 %v944_v46, %v46_v43  ;;  %v982_v51 = vsel %vm341_vm1, %v950_v44, -inf }
 0x83a   :  { %983 = vmax.xlane.f32.xlu0 %v982_v51  ;;  %v3451_v52 = vpop.f32.mrf.mxu1 }
 0x83b   :  { %v960_v54 = vadd.f32 %v3451_v52, %v49_v49  ;;  %v979_v55 = vsel %vm341_vm1, %v945_v50, -inf }
 0x83c   :  { %v954_v56 = vpop.f32.mrf.mxu1  ;;  %980 = vmax.xlane.f32.xlu1 %v979_v55 }
 0x83d   :  { %v955_v59 = vadd.f32 %v954_v56, %v48_v53  ;;  %v988_v61 = vsel %vm341_vm1, %v960_v54, -inf }
 0x83e   :  { %989 = vmax.xlane.f32.xlu0 %v988_v61  ;;  %v3454_v63 = vpop.f32.mrf.mxu1 }
 0x83f   :  { %v970_v1 = vadd.f32 %v3454_v63, %v51_v58  ;;  %v985_v7 = vsel %vm341_vm1, %v955_v59, -inf }
 0x840   :  { %v964_v9 = vpop.f32.mrf.mxu1  ;;  %986 = vmax.xlane.f32.xlu1 %v985_v7  ;;  %v3438_v7 = vpop.f32.mrf.mxu0 }
 0x841   :  { %v965_v10 = vadd.f32 %v964_v9, %v50_v0  ;;  %v994_v15 = vsel %vm341_vm1, %v970_v1, -inf  ;;  %v823_v9 = vadd.f32 %v3438_v7, %v4101_v5 }
 0x842   :  { %995 = vmax.xlane.f32.xlu0 %v994_v15 }
 0x843   :  { %v991_v16 = vsel %vm341_vm1, %v965_v10, -inf }
 0x844   :  { %992 = vmax.xlane.f32.xlu1 %v991_v16 }
 0x8bf   :  { %v978_v17 = vpop.xlane.xlu0 %977 }
 0x8c0   :  { %v998_v14 = vsub.f32 %v940_v39, %v978_v17 }
 0x8c1   :  { %v975_v19 = vpop.xlane.xlu1 %974 }
 0x8c2   :  { %v1007_v20 = vmul.f32 1.442695, %v998_v14  ;;  %v997_v13 = vsub.f32 %v935_v38, %v975_v19 }
 0x8c3   :  { %v984_v21 = vpop.xlane.xlu0 %983 }
 0x8c4   :  { %3701 = vpow2.f32 %v1007_v20  ;;  %v1005_v22 = vmul.f32 1.442695, %v997_v13  ;;  %v1000_v25 = vsub.f32 %v950_v44, %v984_v21 }
 0x8c5   :  { %v981_v26 = vpop.xlane.xlu1 %980 }
 0x8c6   :  { %3703 = vpow2.f32 %v1005_v22  ;;  %v1011_v29 = vmul.f32 1.442695, %v1000_v25  ;;  %v999_v30 = vsub.f32 %v945_v50, %v981_v26 }
 0x8c7   :  { %v990_v33 = vpop.xlane.xlu0 %989 }
 0x8c8   :  { %3705 = vpow2.f32 %v1011_v29  ;;  %v1009_v34 = vmul.f32 1.442695, %v999_v30  ;;  %v1002_v36 = vsub.f32 %v960_v54, %v990_v33 }
 0x8c9   :  { %v987_v37 = vpop.xlane.xlu1 %986 }
 0x8ca   :  { %3707 = vpow2.f32 %v1009_v34  ;;  %v1015_v6 = vmul.f32 1.442695, %v1002_v36  ;;  %v1001_v2 = vsub.f32 %v955_v59, %v987_v37 }
 0x8cb   :  { %v996_v39 = vpop.xlane.xlu0 %995 }
 0x8cc   :  { %3709 = vpow2.f32 %v1015_v6  ;;  %v1013_v40 = vmul.f32 1.442695, %v1001_v2  ;;  %v1004_v38 = vsub.f32 %v970_v1, %v996_v39 }
 0x8cd   :  { %v993_v41 = vpop.xlane.xlu1 %992 }
 0x8ce   :  { %3711 = vpow2.f32 %v1013_v40  ;;  %v1019_v42 = vmul.f32 1.442695, %v1004_v38  ;;  %v1003_v43 = vsub.f32 %v965_v10, %v993_v41  ;;  %v817_v10 = vpop.f32.mrf.mxu0 }
 0x8cf   :  { %v818_v15 = vadd.f32 %v817_v10, %v4101_v5 }
 0x8d0   :  { %3713 = vpow2.f32 %v1019_v42  ;;  %v1017_v44 = vmul.f32 1.442695, %v1003_v43 }
 0x8d1   :  { %v3702_v45 = vpop.eup %3701 }
 0x8d2   :  { %3715 = vpow2.f32 %v1017_v44  ;;  %v1024_v46 = vsel %vm341_vm1, %v3702_v45, 0.0 }
 0x8d3   :  { %v3704_v49 = vpop.eup %3703  ;;  %1025 = vadd.xlane.f32.xlu0 %v1024_v46  ;;  %v74_v46 = vld [vmem:[#allocation2 + $0x70] sm:$0xff] }
 0x8d4   :  { %v1021_v50 = vsel %vm341_vm1, %v3704_v49, 0.0 }
 0x8d5   :  { %v3706_v51 = vpop.eup %3705  ;;  %1022 = vadd.xlane.f32.xlu1 %v1021_v50  ;;  %v72_v50 = vld [vmem:[#allocation2 + $0x60] sm:$0xff] }
 0x8d6   :  { %v1030_v52 = vsel %vm341_vm1, %v3706_v51, 0.0 }
 0x8d7   :  { %v3708_v53 = vpop.eup %3707  ;;  %1031 = vadd.xlane.f32.xlu0 %v1030_v52 }
 0x8d8   :  { %v1027_v54 = vsel %vm341_vm1, %v3708_v53, 0.0 }
 0x8d9   :  { %v3710_v55 = vpop.eup %3709  ;;  %1028 = vadd.xlane.f32.xlu1 %v1027_v54 }
 0x8da   :  { %v1036_v56 = vsel %vm341_vm1, %v3710_v55, 0.0 }
 0x8db   :  { %v3712_v58 = vpop.eup %3711  ;;  %1037 = vadd.xlane.f32.xlu0 %v1036_v56 }
 0x8dc   :  { %v1033_v59 = vsel %vm341_vm1, %v3712_v58, 0.0 }
 0x8dd   :  { %v3714_v61 = vpop.eup %3713  ;;  %1034 = vadd.xlane.f32.xlu1 %v1033_v59 }
 0x8de   :  { %v1042_v63 = vsel %vm341_vm1, %v3714_v61, 0.0 }
 0x8df   :  { %v3716_v0 = vpop.eup %3715  ;;  %1043 = vadd.xlane.f32.xlu0 %v1042_v63 }
 0x8e0   :  { %v1039_v1 = vsel %vm341_vm1, %v3716_v0, 0.0 }
 0x8e1   :  { %1040 = vadd.xlane.f32.xlu1 %v1039_v1 }
 0x8f2   :  { %1065 = vrot.lane.b32.xlu1 %v823_v9, %s3899_s24 }
 0x8f5   :  { %1063 = vrot.lane.b32.xlu0 %v818_v15, %s3899_s24 }
 0x95c   :  { %v1026_v16 = vpop.xlane.xlu0 %1025 }
 0x95e   :  { %v1023_v17 = vpop.xlane.xlu1 %1022 }
 0x95f   :  { %3717 = vrcp.f32 %v1023_v17 }
 0x960   :  { %v1032_v14 = vpop.xlane.xlu0 %1031  ;;  %3719 = vrcp.f32 %v1026_v16 }
 0x962   :  { %v1029_v19 = vpop.xlane.xlu1 %1028 }
 0x963   :  { %3721 = vrcp.f32 %v1029_v19 }
 0x964   :  { %v1038_v20 = vpop.xlane.xlu0 %1037  ;;  %3723 = vrcp.f32 %v1032_v14 }
 0x966   :  { %v1035_v13 = vpop.xlane.xlu1 %1034 }
 0x967   :  { %3725 = vrcp.f32 %v1035_v13 }
 0x968   :  { %3727 = vrcp.f32 %v1038_v20  ;;  %v1044_v21 = vpop.xlane.xlu0 %1043 }
 0x96a   :  { %v1041_v22 = vpop.xlane.xlu1 %1040 }
 0x96b   :  { %3729 = vrcp.f32 %v1041_v22 }
 0x96c   :  { %v3718_v5 = vpop.eup %3717  ;;  %3731 = vrcp.f32 %v1044_v21  ;;  %v1064_v33 = vpop.permute.xlu0 %1063 }
 0x96d   :  { %v1046_v25 = vmul.f32 %v3718_v5, %v3704_v49  ;;  %v3720_v26 = vpop.eup %3719  ;;  %v73_v49 = vld [vmem:[#allocation2 + $0x68] sm:$0xff] }
 0x96e   :  { %v1066_v29 = vpop.permute.xlu1 %1065  ;;  %v1048_v34 = vmul.f32 %v3720_v26, %v3702_v45  ;;  %v75_v45 = vld [vmem:[#allocation2 + $0x78] sm:$0xff] }
 0x96f   :  { %3455 = vmatprep.subr.mxu0 %v1066_v29  ;;  %3459 = vmatprep.mubr.msk.f32.mxu0 %vm341_vm1, %v1046_v25 }
 0x970   :  { %v3722_v30 = vpop.eup %3721  ;;  %3456 = vmatpush3.msra.mxu0 %v1066_v29  ;;  %3471 = vmatprep.subr.mxu1 %v75_v45 }
 0x971   :  { %3457 = vmatprep.subr.mxu0 %v1064_v33  ;;  %v1050_v36 = vmul.f32 %v3722_v30, %v3708_v53  ;;  %v3724_v37 = vpop.eup %3723  ;;  %3472 = vmatpush3.msra.mxu1 %v75_v45 }
 0x972   :  { %3458 = vmatpush3.msra.mxu0 %v1064_v33  ;;  %v1052_v2 = vmul.f32 %v3724_v37, %v3706_v51  ;;  %3473 = vmatprep.subr.mxu1 %v74_v46 }
 0x973   :  { %3460 = vmatmul.mubr.msk.f32.vlgmr.msra.gmra.mxu0 %vm341_vm1, %v1048_v34  ;;  %3474 = vmatpush3.msra.mxu1 %v74_v46 }
 0x974   :  { %v3726_v6 = vpop.eup %3725  ;;  %3462 = vmatprep.mubr.msk.f32.mxu0 %vm341_vm1, %v1050_v36  ;;  %3475 = vmatprep.subr.mxu1 %v73_v49 }
 0x975   :  { %v1054_v39 = vmul.f32 %v3726_v6, %v3712_v58  ;;  %v3728_v40 = vpop.eup %3727  ;;  %3476 = vmatpush3.msra.mxu1 %v73_v49 }
 0x976   :  { %v1056_v41 = vmul.f32 %v3728_v40, %v3710_v55  ;;  %3477 = vmatprep.subr.mxu1 %v72_v50  ;;  %v76_v40 = vld [vmem:[#allocation2 + $0x80] sm:$0xff] }
 0x977   :  { %3463 = vmatmul.mubr.msk.f32.gmra.mxu0 %vm341_vm1, %v1052_v2  ;;  %3478 = vmatpush3.msra.mxu1 %v72_v50  ;;  %v79_v2 = vld [vmem:[#allocation2 + $0x98] sm:$0xff] }
 0x978   :  { %v3730_v38 = vpop.eup %3729  ;;  %3465 = vmatprep.mubr.msk.f32.mxu0 %vm341_vm1, %v1054_v39  ;;  %3482 = vmatprep.subr.mxu1 %v79_v2  ;;  %v77_v39 = vld [vmem:[#allocation2 + $0x88] sm:$0xff] }
 0x979   :  { %v1058_v42 = vmul.f32 %v3730_v38, %v3716_v0  ;;  %v3732_v43 = vpop.eup %3731  ;;  %v87_v38 = vld [vmem:[#allocation2 + $0xd8] sm:$0xff] }
 0x97a   :  { %v1060_v44 = vmul.f32 %v3732_v43, %v3714_v61  ;;  %3493 = vmatprep.subr.mxu0 %v87_v38  ;;  %v84_v43 = vld [vmem:[#allocation2 + $0xc0] sm:$0xff] }
 0x97b   :  { %3466 = vmatmul.mubr.msk.f32.gmra.mxu0 %vm341_vm1, %v1056_v41  ;;  %v86_v41 = vld [vmem:[#allocation2 + $0xd0] sm:$0xff] }
 0x97c   :  { %3468 = vmatprep.mubr.msk.f32.mxu0 %vm341_vm1, %v1058_v42  ;;  %3494 = vmatpush3.msra.mxu0 %v87_v38  ;;  %v85_v42 = vld [vmem:[#allocation2 + $0xc8] sm:$0xff]  ;;  %v1551_v38 = vld [vmem:[#allocation2 + $0xf8] sm:$0xff] }
 0x97d   :  { %3495 = vmatprep.subr.mxu0 %v86_v41 }
 0x97e   :  { %3496 = vmatpush3.msra.mxu0 %v86_v41  ;;  %v1550_v41 = vld [vmem:[#allocation2 + $0xf0] sm:$0xff] }
 0x97f   :  { %3469 = vmatmul.mubr.msk.f32.gmra.mxu0 %vm341_vm1, %v1060_v44  ;;  %3497 = vmatprep.subr.mxu0 %v85_v42 }
 0x980   :  { %3498 = vmatpush3.msra.mxu0 %v85_v42 }
 0x981   :  { %3499 = vmatprep.subr.mxu0 %v84_v43 }
 0x982   :  { %3500 = vmatpush3.msra.mxu0 %v84_v43 }
 0xa33   :  { %v3461_v51 = vpop.f32.mrf.mxu0 }
 0xa34   :  { %v1199_v0 = vmul.f32 %v3461_v51, %v3973_v23  ;;  %v4170_v23 = vld [vmem:[#allocation2 + $0xe0] sm:$0xff] }
 0xa35   :  { %v1159_v52 = vpop.f32.mrf.mxu0 }
 0xa36   :  { %v1198_v61 = vmul.f32 %v1159_v52, %v3964_v18  ;;  %v4168_v18 = vsub.s32 3, %v3952_v11  ;;  %v4180_v52 = vld [vmem:[#allocation2 + $0xe8] sm:$0xff] }
 0xa37   :  { %v3464_v53 = vpop.f32.mrf.mxu0 }
 0xa38   :  { %v1201_v58 = vmul.f32 %v3464_v53, %v3981_v27 }
 0xa39   :  { %v1169_v54 = vpop.f32.mrf.mxu0 }
 0xa3a   :  { %v1200_v56 = vmul.f32 %v1169_v54, %v3976_v24  ;;  %v1207_v10 = vadd.f32 %v1201_v58, %v1199_v0  ;;  %v1328_v54 = vrot.slane %v4180_v52, %v3955_v12 }
 0xa3b   :  { %v3467_v55 = vpop.f32.mrf.mxu0 }
 0xa3c   :  { %v1203_v1 = vmul.f32 %v3467_v55, %v3989_v31  ;;  %v1206_v9 = vadd.f32 %v1200_v56, %v1198_v61  ;;  %v1334_v61 = vrot.slane %v4180_v52, %v4046_v8 }
 0xa3d   :  { %v1179_v59 = vpop.f32.mrf.mxu0 }
 0xa3e   :  { %v1202_v63 = vmul.f32 %v1179_v59, %v3984_v28  ;;  %v1209_v14 = vadd.f32 %v1207_v10, %v1203_v1  ;;  %v1215_v28 = vrot.slane %v4170_v23, %v4168_v18  ;;  %v81_v10 = vld [vmem:[#allocation2 + $0xa8] sm:$0xff] }
 0xa3f   :  { %v3470_v7 = vpop.f32.mrf.mxu0 }
 0xa40   :  { %v1205_v15 = vmul.f32 %v3470_v7, %v3997_v35  ;;  %v1208_v17 = vadd.f32 %v1206_v9, %v1202_v63  ;;  %v83_v7 = vld [vmem:[#allocation2 + $0xb8] sm:$0xff]  ;;  %v82_v9 = vld [vmem:[#allocation2 + $0xb0] sm:$0xff] }
 0xa41   :  { %v1189_v16 = vpop.f32.mrf.mxu0  ;;  %3501 = vmatprep.subr.mxu0 %v83_v7 }
 0xa42   :  { %v1204_v24 = vmul.f32 %v1189_v16, %v3992_v32  ;;  %v1211_v19 = vadd.f32 %v1209_v14, %v1205_v15  ;;  %3502 = vmatpush3.msra.mxu0 %v83_v7  ;;  %v80_v15 = vld [vmem:[#allocation2 + $0xa0] sm:$0xff]  ;;  %v1339_v16 = vsub.s32 4, %v3952_v11  ;;  %v4220_v7 = vld [vmem:[%s4460_s0 + $0x18] sm:$0xff] }
 0xa43   :  { %3503 = vmatprep.subr.mxu0 %v82_v9 }
 0xa44   :  { %v1210_v27 = vadd.f32 %v1208_v17, %v1204_v24  ;;  %3504 = vmatpush3.msra.mxu0 %v82_v9  ;;  %v1340_v17 = vrot.slane %v4170_v23, %v1339_v16  ;;  %v4230_v9 = vld [vmem:[#allocation2 + $0x1d0] sm:$0xff] }
 0xa45   :  { %3505 = vmatprep.subr.mxu0 %v81_v10 }
 0xa46   :  { %3479 = vmatprep.mubr.msk.f32.mxu1 %vm96_vm0, %v1210_v27  ;;  %3506 = vmatpush3.msra.mxu0 %v81_v10  ;;  %v4234_v10 = vrot.slane %v4230_v9, %v3955_v12 }
 0xa47   :  { %3480 = vmatmul.mubr.msk.f32.vlgmr.msra.gmra.mxu1 %vm96_vm0, %v1211_v19  ;;  %3507 = vmatprep.subr.mxu0 %v80_v15 }
 0xa48   :  { %3483 = vmatpush3.msra.mxu1 %v79_v2  ;;  %3508 = vmatpush3.msra.mxu0 %v80_v15 }
 0xb07   :  { %v3481_v31 = vpop.f32.mrf.mxu1 }
 0xb08   :  { %v1294_v35 = vadd.f32 %v3481_v31, %v1215_v28 }
 0xb09   :  { %v1288_v20 = vpop.f32.mrf.mxu1 }
 0xb0a   :  { %v1289_v13 = vadd.f32 %v1288_v20, %v1215_v28  ;;  %v1298_v32 = vadd.f32 %v1294_v35, %v4064_v57  ;;  %v1426_v35 = vsub.s32 5, %v3952_v11 }
 0xb0c   :  { %v1302_v21 = vsel %vm96_vm0, %v1298_v32, 0.0  ;;  %v1297_v22 = vadd.f32 %v1289_v13, %v4072_v60  ;;  %v78_v60 = vld [vmem:[#allocation2 + $0x90] sm:$0xff]  ;;  %v1427_v20 = vrot.slane %v4170_v23, %v1426_v35 }
 0xb0d   :  { %1303 = vadd.xlane.f32.xlu0 %v1302_v21  ;;  %3484 = vmatprep.subr.mxu1 %v78_v60 }
 0xb0e   :  { %v1299_v5 = vsel %vm96_vm0, %v1297_v22, 0.0  ;;  %3485 = vmatpush3.msra.mxu1 %v78_v60 }
 0xb0f   :  { %1300 = vadd.xlane.f32.xlu1 %v1299_v5  ;;  %3486 = vmatprep.subr.mxu1 %v77_v39 }
 0xb10   :  { %3487 = vmatpush3.msra.mxu1 %v77_v39  ;;  %v1553_v39 = vld [vmem:[#allocation2 + $0x108] sm:$0xff] }
 0xb11   :  { %3488 = vmatprep.subr.mxu1 %v76_v40 }
 0xb12   :  { %3489 = vmatpush3.msra.mxu1 %v76_v40  ;;  %v1552_v40 = vld [vmem:[#allocation2 + $0x100] sm:$0xff] }
 0xb13   :  { %3512 = vmatprep.subr.mxu1 %v1553_v39 }
 0xb96   :  { %v1304_v25 = vpop.xlane.xlu0 %1303 }
 0xb97   :  { %v1306_v26 = vmul.f32 0.03125, %v1304_v25 }
 0xb98   :  { %v1301_v29 = vpop.xlane.xlu1 %1300 }
 0xb99   :  { %v1308_v30 = vsub.f32 %v1298_v32, %v1306_v26  ;;  %v1305_v33 = vmul.f32 0.03125, %v1301_v29 }
 0xb9b   :  { %v1307_v34 = vsub.f32 %v1297_v22, %v1305_v33  ;;  %v1310_v36 = vmul.f32 %v1308_v30, %v1308_v30 }
 0xb9d   :  { %v1314_v37 = vsel %vm96_vm0, %v1310_v36, 0.0  ;;  %v1309_v6 = vmul.f32 %v1307_v34, %v1307_v34 }
 0xb9e   :  { %1315 = vadd.xlane.f32.xlu0 %v1314_v37 }
 0xb9f   :  { %v1311_v57 = vsel %vm96_vm0, %v1309_v6, 0.0 }
 0xba0   :  { %1312 = vadd.xlane.f32.xlu1 %v1311_v57 }
 0xc27   :  { %v1316_v44 = vpop.xlane.xlu0 %1315 }
 0xc28   :  { %v1318_v45 = vmul.f32 0.03125, %v1316_v44 }
 0xc29   :  { %v1313_v46 = vpop.xlane.xlu1 %1312 }
 0xc2a   :  { %v1320_v49 = vadd.f32 1e-05, %v1318_v45  ;;  %v1317_v50 = vmul.f32 0.03125, %v1313_v46 }
 0xc2c   :  { %3733 = vrsqrt.f32 %v1320_v49  ;;  %v1319_v51 = vadd.f32 1e-05, %v1317_v50  ;;  %v1541_v50 = vrot.slane %v4180_v52, %v4097_v3 }
 0xc2e   :  { %3735 = vrsqrt.f32 %v1319_v51 }
 0xc39   :  { %v3734_v53 = vpop.eup %3733 }
 0xc3a   :  { %v1324_v55 = vmul.f32 %v3734_v53, %v1308_v30 }
 0xc3b   :  { %v3736_v56 = vpop.eup %3735 }
 0xc3c   :  { %v1323_v58 = vmul.f32 %v3736_v56, %v1307_v34  ;;  %v1330_v59 = vmul.f32 %v1328_v54, %v1324_v55  ;;  %v1547_v55 = vrot.slane %v4180_v52, %v4168_v18 }
 0xc3e   :  { %v1329_v63 = vmul.f32 %v1328_v54, %v1323_v58  ;;  %v1336_v1 = vadd.f32 %v1334_v61, %v1330_v59 }
 0xc40   :  { %v1335_v0 = vadd.f32 %v1334_v61, %v1329_v63 }
 0xc42   :  { %3490 = vmatprep.mubr.msk.f32.mxu1 %vm96_vm0, %v1335_v0 }
 0xc43   :  { %3491 = vmatmul.mubr.msk.f32.vlgmr.msra.gmra.mxu1 %vm96_vm0, %v1336_v1 }
 0xc44   :  { %3513 = vmatpush3.msra.mxu1 %v1553_v39 }
 0xc45   :  { %3514 = vmatprep.subr.mxu1 %v1552_v40 }
 0xc46   :  { %3515 = vmatpush3.msra.mxu1 %v1552_v40 }
 0xc47   :  { %3516 = vmatprep.subr.mxu1 %v1551_v38 }
 0xc48   :  { %3517 = vmatpush3.msra.mxu1 %v1551_v38 }
 0xc49   :  { %3518 = vmatprep.subr.mxu1 %v1550_v41 }
 0xc4a   :  { %3519 = vmatpush3.msra.mxu1 %v1550_v41  ;;  %v3834_v41 = vld [vmem:[#allocation2 + $0x200] sm:$0xff] }
 0xd03   :  { %v3492_v24 = vpop.f32.mrf.mxu1 }
 0xd04   :  { %v1419_v14 = vadd.f32 %v3492_v24, %v1340_v17 }
 0xd05   :  { %v1413_v27 = vpop.f32.mrf.mxu1 }
 0xd06   :  { %v1414_v19 = vadd.f32 %v1413_v27, %v1340_v17  ;;  %v1423_v31 = vmax.f32 %v1419_v14, 0.0  ;;  %v4240_v27 = vld [vmem:[#allocation2 + $0x268] sm:$0xff] }
 0xd08   :  { %v1422_v28 = vmax.f32 %v1414_v19, 0.0 }
 0xd0a   :  { %3509 = vmatprep.mubr.msk.f32.mxu0 %vm1428_vm2, %v1422_v28 }
 0xd0b   :  { %3510 = vmatmul.mubr.msk.f32.vlgmr.msra.gmra.mxu0 %vm1428_vm2, %v1423_v31 }
 0xdcb   :  { %v3511_v13 = vpop.f32.mrf.mxu0 }
 0xdcc   :  { %v1507_v32 = vadd.f32 %v3511_v13, %v1427_v20 }
 0xdcd   :  { %v1501_v21 = vpop.f32.mrf.mxu0 }
 0xdce   :  { %v1502_v22 = vadd.f32 %v1501_v21, %v1427_v20  ;;  %v1511_v5 = vadd.f32 %v1507_v32, %v1336_v1  ;;  %v4248_v20 = vld [vmem:[#allocation2 + $0x270] sm:$0xff]  ;;  %v4251_v32 = vld [vmem:[#allocation2 + $0x278] sm:$0xff] }
 0xdd0   :  { %v1515_v25 = vsel %vm96_vm0, %v1511_v5, 0.0  ;;  %v1510_v26 = vadd.f32 %v1502_v22, %v1335_v0  ;;  %v4213_v0 = vld [vmem:[%s4460_s0 + $0x10] sm:$0xff]  ;;  %v4256_v22 = vld [vmem:[#allocation2 + $0x280] sm:$0xff] }
 0xdd1   :  { %1516 = vadd.xlane.f32.xlu0 %v1515_v25  ;;  %v4259_v25 = vld [vmem:[#allocation2 + $0x288] sm:$0xff] }
 0xdd2   :  { %v1512_v29 = vsel %vm96_vm0, %v1510_v26, 0.0 }
 0xdd3   :  { %1513 = vadd.xlane.f32.xlu1 %v1512_v29  ;;  %v4264_v29 = vld [vmem:[#allocation2 + $0x290] sm:$0xff] }
 0xe5a   :  { %v1517_v30 = vpop.xlane.xlu0 %1516 }
 0xe5b   :  { %v1519_v33 = vmul.f32 0.03125, %v1517_v30 }
 0xe5c   :  { %v1514_v34 = vpop.xlane.xlu1 %1513 }
 0xe5d   :  { %v1521_v36 = vsub.f32 %v1511_v5, %v1519_v33  ;;  %v1518_v37 = vmul.f32 0.03125, %v1514_v34  ;;  %v4267_v33 = vld [vmem:[#allocation2 + $0x298] sm:$0xff] }
 0xe5f   :  { %v1520_v6 = vsub.f32 %v1510_v26, %v1518_v37  ;;  %v1523_v57 = vmul.f32 %v1521_v36, %v1521_v36 }
 0xe61   :  { %v1527_v23 = vsel %vm96_vm0, %v1523_v57, 0.0  ;;  %v1522_v2 = vmul.f32 %v1520_v6, %v1520_v6  ;;  %v3832_v57 = vld [vmem:[#allocation2 + $0x1f0] sm:$0xff] }
 0xe62   :  { %1528 = vadd.xlane.f32.xlu0 %v1527_v23 }
 0xe63   :  { %v1524_v60 = vsel %vm96_vm0, %v1522_v2, 0.0 }
 0xe64   :  { %1525 = vadd.xlane.f32.xlu1 %v1524_v60  ;;  %v3833_v60 = vld [vmem:[#allocation2 + $0x1e8] sm:$0xff] }
 0xeeb   :  { %v1529_v42 = vpop.xlane.xlu0 %1528 }
 0xeec   :  { %v1531_v43 = vmul.f32 0.03125, %v1529_v42 }
 0xeed   :  { %v1526_v44 = vpop.xlane.xlu1 %1525 }
 0xeee   :  { %v1533_v45 = vadd.f32 1e-05, %v1531_v43  ;;  %v1530_v46 = vmul.f32 0.03125, %v1526_v44 }
 0xef0   :  { %3737 = vrsqrt.f32 %v1533_v45  ;;  %v1532_v49 = vadd.f32 1e-05, %v1530_v46  ;;  %v3835_v45 = vld [vmem:[#allocation2 + $0x1f8] sm:$0xff] }
 0xef2   :  { %3739 = vrsqrt.f32 %v1532_v49 }
 0xefd   :  { %v3738_v51 = vpop.eup %3737 }
 0xefe   :  { %v1537_v53 = vmul.f32 %v3738_v51, %v1521_v36  ;;  %v4272_v36 = vld [vmem:[#allocation2 + $0x2a0] sm:$0xff]  ;;  %v3836_v51 = vld [vmem:[#allocation2 + $0x210] sm:$0xff] }
 0xeff   :  { %v3740_v54 = vpop.eup %3739 }
 0xf00   :  { %v1536_v56 = vmul.f32 %v3740_v54, %v1520_v6  ;;  %v1543_v58 = vmul.f32 %v1541_v50, %v1537_v53 }
 0xf02   :  { %v1542_v59 = vmul.f32 %v1541_v50, %v1536_v56  ;;  %v4206_v61 = vadd.f32 %v1547_v55, %v1543_v58  ;;  %v3837_v56 = vld [vmem:[#allocation2 + $0x208] sm:$0xff] }
 0xf04   :  { %v4208_v63 = vadd.f32 %v1547_v55, %v1542_v59  ;;  %v1581_v52 = vadd.f32 %v4220_v7, %v4206_v61 }
 0xf06   :  { %v1580_v1 = vadd.f32 %v4213_v0, %v4208_v63 }
 0xf08   :  { %3520 = vmatprep.mubr.msk.f32.mxu1 %vm96_vm0, %v1580_v1 }
 0xf09   :  { %3521 = vmatmul.mubr.msk.f32.vlgmr.msra.gmra.mxu1 %vm96_vm0, %v1581_v52  ;;  %v3838_v52 = vld [vmem:[#allocation2 + $0x220] sm:$0xff] }
 0xf0a   :  { %3523 = vmatprep.mubr.msk.f32.mxu1 %vm96_vm0, %v4208_v63 }
 0xf0d   :  { %3524 = vmatmul.mubr.msk.f32.gmra.mxu1 %vm96_vm0, %v4206_v61 }
 0xfc9   :  { %v3522_v15 = vpop.f32.mrf.mxu1 }
 0xfca   :  { %v1670_v17 = vadd.f32 %v3522_v15, %v4234_v10 }
 0xfcb   :  { %v1664_v24 = vpop.f32.mrf.mxu1 }
 0xfcc   :  { %v1665_v14 = vadd.f32 %v1664_v24, %v4234_v10  ;;  %1695 = vrot.lane.b32.xlu1 %v1670_v17, %s3898_s23  ;;  %v1684_v13 = vmul.f32 %v4248_v20, %v1670_v17  ;;  %v1686_v5 = vmul.f32 %v4256_v22, %v1670_v17  ;;  %v1688_v30 = vmul.f32 %v4264_v29, %v1670_v17 }
 0xfcd   :  { %v1690_v37 = vmul.f32 %v4272_v36, %v1670_v17 }
 0xfce   :  { %1693 = vrot.lane.b32.xlu0 %v1665_v14, %s3898_s23  ;;  %v1683_v19 = vmul.f32 %v4240_v27, %v1665_v14  ;;  %v1685_v21 = vmul.f32 %v4251_v32, %v1665_v14  ;;  %v1687_v26 = vmul.f32 %v4259_v25, %v1665_v14  ;;  %v1689_v34 = vmul.f32 %v4267_v33, %v1665_v14  ;;  %v3839_v14 = vld [vmem:[#allocation2 + $0x218] sm:$0xff] }
 0xfd0   :  { %3530 = vmatprep.mubr.msk.f32.mxu0 %vm96_vm0, %v1683_v19 }
0x103e   :  { %v1696_v28 = vpop.permute.xlu1 %1695 }
0x103f   :  { %3526 = vmatprep.subr.msk.mxu0 %vm96_vm0, %v1696_v28 }
0x1040   :  { %3527 = vmatpush3.xpose.msk.msra.mxu0 %vm96_vm0, %v1696_v28  ;;  %v1694_v31 = vpop.permute.xlu0 %1693 }
0x1041   :  { %3528 = vmatprep.subr.msk.mxu0 %vm96_vm0, %v1694_v31 }
0x1044   :  { %3529 = vmatpush3.xpose.msk.msra.mxu0 %vm96_vm0, %v1694_v31 }
0x1047   :  { %3531 = vmatmul.mubr.msk.f32.vlgmr.msra.gmra.mxu0 %vm96_vm0, %v1684_v13 }
0x1048   :  { %3533 = vmatprep.mubr.msk.f32.mxu0 %vm96_vm0, %v1685_v21 }
0x104b   :  { %3534 = vmatmul.mubr.msk.f32.gmra.mxu0 %vm96_vm0, %v1686_v5 }
0x104c   :  { %3536 = vmatprep.mubr.msk.f32.mxu0 %vm96_vm0, %v1687_v26 }
0x104f   :  { %3537 = vmatmul.mubr.msk.f32.gmra.mxu0 %vm96_vm0, %v1688_v30 }
0x1050   :  { %3539 = vmatprep.mubr.msk.f32.mxu0 %vm96_vm0, %v1689_v34 }
0x1053   :  { %3540 = vmatmul.mubr.msk.f32.gmra.mxu0 %vm96_vm0, %v1690_v37 }
0x1107   :  { %v3532_v6 = vpop.f32.mrf.mxu0 }
0x1108   :  { %v1797_v23 = vadd.f32 %v3832_v57, %v3532_v6 }
0x1109   :  { %v1791_v2 = vpop.f32.mrf.mxu0 }
0x110a   :  { %v1792_v39 = vadd.f32 %v3833_v60, %v1791_v2  ;;  %v1833_v40 = vsel %vm341_vm1, %v1797_v23, -inf }
0x110b   :  { %1834 = vmax.xlane.f32.xlu0 %v1833_v40  ;;  %v3535_v38 = vpop.f32.mrf.mxu0 }
0x110c   :  { %v1807_v42 = vadd.f32 %v3834_v41, %v3535_v38  ;;  %v1830_v43 = vsel %vm341_vm1, %v1792_v39, -inf }
0x110d   :  { %v1801_v44 = vpop.f32.mrf.mxu0  ;;  %1831 = vmax.xlane.f32.xlu1 %v1830_v43 }
0x110e   :  { %v1802_v46 = vadd.f32 %v3835_v45, %v1801_v44  ;;  %v1839_v49 = vsel %vm341_vm1, %v1807_v42, -inf }
0x110f   :  { %1840 = vmax.xlane.f32.xlu0 %v1839_v49  ;;  %v3538_v50 = vpop.f32.mrf.mxu0 }
0x1110   :  { %v1817_v53 = vadd.f32 %v3836_v51, %v3538_v50  ;;  %v1836_v54 = vsel %vm341_vm1, %v1802_v46, -inf }
0x1111   :  { %v1811_v55 = vpop.f32.mrf.mxu0  ;;  %1837 = vmax.xlane.f32.xlu1 %v1836_v54 }
0x1112   :  { %v1812_v58 = vadd.f32 %v3837_v56, %v1811_v55  ;;  %v1845_v59 = vsel %vm341_vm1, %v1817_v53, -inf }
0x1113   :  { %1846 = vmax.xlane.f32.xlu0 %v1845_v59  ;;  %v3541_v1 = vpop.f32.mrf.mxu0 }
0x1114   :  { %v1827_v15 = vadd.f32 %v3838_v52, %v3541_v1  ;;  %v1842_v17 = vsel %vm341_vm1, %v1812_v58, -inf }
0x1115   :  { %v1821_v24 = vpop.f32.mrf.mxu0  ;;  %1843 = vmax.xlane.f32.xlu1 %v1842_v17 }
0x1116   :  { %v1822_v19 = vadd.f32 %v3839_v14, %v1821_v24  ;;  %v1851_v28 = vsel %vm341_vm1, %v1827_v15, -inf }
0x1117   :  { %1852 = vmax.xlane.f32.xlu0 %v1851_v28 }
0x1118   :  { %v1848_v31 = vsel %vm341_vm1, %v1822_v19, -inf }
0x1119   :  { %1849 = vmax.xlane.f32.xlu1 %v1848_v31 }
0x1194   :  { %v1835_v13 = vpop.xlane.xlu0 %1834 }
0x1195   :  { %v1855_v21 = vsub.f32 %v1797_v23, %v1835_v13 }
0x1196   :  { %v1832_v5 = vpop.xlane.xlu1 %1831 }
0x1197   :  { %v1864_v26 = vmul.f32 1.442695, %v1855_v21  ;;  %v1854_v30 = vsub.f32 %v1792_v39, %v1832_v5  ;;  %v3525_v21 = vpop.f32.mrf.mxu1 }
0x1198   :  { %v1841_v34 = vpop.xlane.xlu0 %1840  ;;  %v1680_v5 = vadd.f32 %v3525_v21, %v4234_v10 }
0x1199   :  { %3741 = vpow2.f32 %v1864_v26  ;;  %v1862_v37 = vmul.f32 1.442695, %v1854_v30  ;;  %v1857_v6 = vsub.f32 %v1807_v42, %v1841_v34  ;;  %v1674_v26 = vpop.f32.mrf.mxu1 }
0x119a   :  { %v1838_v57 = vpop.xlane.xlu1 %1837  ;;  %v1675_v30 = vadd.f32 %v1674_v26, %v4234_v10 }
0x119b   :  { %3743 = vpow2.f32 %v1862_v37  ;;  %v1868_v2 = vmul.f32 1.442695, %v1857_v6  ;;  %v1856_v60 = vsub.f32 %v1802_v46, %v1838_v57 }
0x119c   :  { %v1847_v40 = vpop.xlane.xlu0 %1846 }
0x119d   :  { %3745 = vpow2.f32 %v1868_v2  ;;  %v1866_v38 = vmul.f32 1.442695, %v1856_v60  ;;  %v1859_v41 = vsub.f32 %v1817_v53, %v1847_v40 }
0x119e   :  { %v1844_v43 = vpop.xlane.xlu1 %1843 }
0x119f   :  { %3747 = vpow2.f32 %v1866_v38  ;;  %v1872_v44 = vmul.f32 1.442695, %v1859_v41  ;;  %v1858_v45 = vsub.f32 %v1812_v58, %v1844_v43 }
0x11a0   :  { %v1853_v23 = vpop.xlane.xlu0 %1852 }
0x11a1   :  { %3749 = vpow2.f32 %v1872_v44  ;;  %v1870_v49 = vmul.f32 1.442695, %v1858_v45  ;;  %v1861_v39 = vsub.f32 %v1827_v15, %v1853_v23 }
0x11a2   :  { %v1850_v50 = vpop.xlane.xlu1 %1849 }
0x11a3   :  { %3751 = vpow2.f32 %v1870_v49  ;;  %v1876_v51 = vmul.f32 1.442695, %v1861_v39  ;;  %v1860_v42 = vsub.f32 %v1822_v19, %v1850_v50 }
0x11a5   :  { %3753 = vpow2.f32 %v1876_v51  ;;  %v1874_v54 = vmul.f32 1.442695, %v1860_v42 }
0x11a6   :  { %v3742_v55 = vpop.eup %3741 }
0x11a7   :  { %3755 = vpow2.f32 %v1874_v54  ;;  %v1881_v46 = vsel %vm341_vm1, %v3742_v55, 0.0 }
0x11a8   :  { %v3744_v56 = vpop.eup %3743  ;;  %1882 = vadd.xlane.f32.xlu0 %v1881_v46 }
0x11a9   :  { %v1878_v53 = vsel %vm341_vm1, %v3744_v56, 0.0 }
0x11aa   :  { %v3746_v59 = vpop.eup %3745  ;;  %1879 = vadd.xlane.f32.xlu1 %v1878_v53 }
0x11ab   :  { %v1887_v58 = vsel %vm341_vm1, %v3746_v59, 0.0 }
0x11ac   :  { %v3748_v1 = vpop.eup %3747  ;;  %1888 = vadd.xlane.f32.xlu0 %v1887_v58 }
0x11ad   :  { %v1884_v52 = vsel %vm341_vm1, %v3748_v1, 0.0 }
0x11ae   :  { %v3750_v15 = vpop.eup %3749  ;;  %1885 = vadd.xlane.f32.xlu1 %v1884_v52  ;;  %v1557_v52 = vld [vmem:[#allocation2 + $0x128] sm:$0xff] }
0x11af   :  { %v1893_v17 = vsel %vm341_vm1, %v3750_v15, 0.0  ;;  %3558 = vmatprep.subr.mxu0 %v1557_v52 }
0x11b0   :  { %v3752_v24 = vpop.eup %3751  ;;  %1894 = vadd.xlane.f32.xlu0 %v1893_v17  ;;  %3559 = vmatpush3.msra.mxu0 %v1557_v52  ;;  %v1555_v17 = vld [vmem:[#allocation2 + $0x118] sm:$0xff] }
0x11b1   :  { %v1890_v14 = vsel %vm341_vm1, %v3752_v24, 0.0 }
0x11b2   :  { %v3754_v19 = vpop.eup %3753  ;;  %1891 = vadd.xlane.f32.xlu1 %v1890_v14 }
0x11b3   :  { %v1899_v28 = vsel %vm341_vm1, %v3754_v19, 0.0 }
0x11b4   :  { %v3756_v31 = vpop.eup %3755  ;;  %1900 = vadd.xlane.f32.xlu0 %v1899_v28 }
0x11b5   :  { %v1896_v13 = vsel %vm341_vm1, %v3756_v31, 0.0 }
0x11b6   :  { %1897 = vadd.xlane.f32.xlu1 %v1896_v13 }
0x11c7   :  { %1922 = vrot.lane.b32.xlu1 %v1680_v5, %s3899_s24 }
0x11ca   :  { %1920 = vrot.lane.b32.xlu0 %v1675_v30, %s3899_s24 }
0x1231   :  { %v1883_v34 = vpop.xlane.xlu0 %1882 }
0x1233   :  { %v1880_v37 = vpop.xlane.xlu1 %1879 }
0x1234   :  { %3757 = vrcp.f32 %v1880_v37 }
0x1235   :  { %v1889_v6 = vpop.xlane.xlu0 %1888  ;;  %3759 = vrcp.f32 %v1883_v34 }
0x1237   :  { %v1886_v57 = vpop.xlane.xlu1 %1885 }
0x1238   :  { %3761 = vrcp.f32 %v1886_v57 }
0x1239   :  { %v1895_v2 = vpop.xlane.xlu0 %1894  ;;  %3763 = vrcp.f32 %v1889_v6 }
0x123b   :  { %v1892_v60 = vpop.xlane.xlu1 %1891 }
0x123c   :  { %3765 = vrcp.f32 %v1892_v60 }
0x123d   :  { %3767 = vrcp.f32 %v1895_v2  ;;  %v1901_v40 = vpop.xlane.xlu0 %1900 }
0x123f   :  { %v1898_v38 = vpop.xlane.xlu1 %1897 }
0x1240   :  { %3769 = vrcp.f32 %v1898_v38 }
0x1241   :  { %v3758_v41 = vpop.eup %3757  ;;  %3771 = vrcp.f32 %v1901_v40  ;;  %v1921_v23 = vpop.permute.xlu0 %1920 }
0x1242   :  { %v1903_v10 = vmul.f32 %v3758_v41, %v3744_v56  ;;  %v3760_v43 = vpop.eup %3759 }
0x1243   :  { %v1923_v44 = vpop.permute.xlu1 %1922  ;;  %v1905_v49 = vmul.f32 %v3760_v43, %v3742_v55 }
0x1244   :  { %3542 = vmatprep.subr.mxu1 %v1923_v44  ;;  %3546 = vmatprep.mubr.msk.f32.mxu1 %vm341_vm1, %v1903_v10 }
0x1245   :  { %v3762_v45 = vpop.eup %3761  ;;  %3543 = vmatpush3.msra.mxu1 %v1923_v44 }
0x1246   :  { %3544 = vmatprep.subr.mxu1 %v1921_v23  ;;  %v1907_v39 = vmul.f32 %v3762_v45, %v3748_v1  ;;  %v3764_v50 = vpop.eup %3763  ;;  %v2072_v45 = vrot.slane %v4230_v9, %v4046_v8 }
0x1247   :  { %3545 = vmatpush3.msra.mxu1 %v1921_v23  ;;  %v1909_v42 = vmul.f32 %v3764_v50, %v3746_v59  ;;  %v1556_v59 = vld [vmem:[#allocation2 + $0x120] sm:$0xff] }
0x1248   :  { %3547 = vmatmul.mubr.msk.f32.vlgmr.msra.gmra.mxu1 %vm341_vm1, %v1905_v49  ;;  %3560 = vmatprep.subr.mxu0 %v1556_v59 }
0x1249   :  { %v3766_v51 = vpop.eup %3765  ;;  %3549 = vmatprep.mubr.msk.f32.mxu1 %vm341_vm1, %v1907_v39  ;;  %3561 = vmatpush3.msra.mxu0 %v1556_v59 }
0x124a   :  { %v1911_v54 = vmul.f32 %v3766_v51, %v3752_v24  ;;  %v3768_v46 = vpop.eup %3767  ;;  %3562 = vmatprep.subr.mxu0 %v1555_v17  ;;  %v1554_v24 = vld [vmem:[#allocation2 + $0x110] sm:$0xff] }
0x124b   :  { %v1913_v53 = vmul.f32 %v3768_v46, %v3750_v15  ;;  %3563 = vmatpush3.msra.mxu0 %v1555_v17 }
0x124c   :  { %3550 = vmatmul.mubr.msk.f32.gmra.mxu1 %vm341_vm1, %v1909_v42  ;;  %3564 = vmatprep.subr.mxu0 %v1554_v24 }
0x124d   :  { %v3770_v56 = vpop.eup %3769  ;;  %3552 = vmatprep.mubr.msk.f32.mxu1 %vm341_vm1, %v1911_v54  ;;  %3565 = vmatpush3.msra.mxu0 %v1554_v24 }
0x124e   :  { %v1915_v58 = vmul.f32 %v3770_v56, %v3756_v31  ;;  %v3772_v55 = vpop.eup %3771 }
0x124f   :  { %v1917_v1 = vmul.f32 %v3772_v55, %v3754_v19 }
0x1250   :  { %3553 = vmatmul.mubr.msk.f32.gmra.mxu1 %vm341_vm1, %v1913_v53 }
0x1251   :  { %3555 = vmatprep.mubr.msk.f32.mxu1 %vm341_vm1, %v1915_v58 }
0x1254   :  { %3556 = vmatmul.mubr.msk.f32.gmra.mxu1 %vm341_vm1, %v1917_v1 }
0x1308   :  { %v3548_v15 = vpop.f32.mrf.mxu1 }
0x1309   :  { %v2056_v34 = vmul.f32 %v4248_v20, %v3548_v15  ;;  %v1561_v15 = vld [vmem:[#allocation2 + $0x148] sm:$0xff] }
0x130a   :  { %v2016_v14 = vpop.f32.mrf.mxu1  ;;  %3569 = vmatprep.subr.mxu1 %v1561_v15 }
0x130b   :  { %v2055_v26 = vmul.f32 %v4240_v27, %v2016_v14  ;;  %3570 = vmatpush3.msra.mxu1 %v1561_v15  ;;  %v1559_v14 = vld [vmem:[#allocation2 + $0x138] sm:$0xff] }
0x130c   :  { %v3551_v28 = vpop.f32.mrf.mxu1 }
0x130d   :  { %v2058_v21 = vmul.f32 %v4256_v22, %v3551_v28  ;;  %v1558_v28 = vld [vmem:[#allocation2 + $0x130] sm:$0xff] }
0x130e   :  { %v2026_v31 = vpop.f32.mrf.mxu1 }
0x130f   :  { %v2057_v19 = vmul.f32 %v4251_v32, %v2026_v31  ;;  %v2064_v2 = vadd.f32 %v2058_v21, %v2056_v34 }
0x1310   :  { %v3554_v13 = vpop.f32.mrf.mxu1 }
0x1311   :  { %v2060_v37 = vmul.f32 %v4264_v29, %v3554_v13  ;;  %v2063_v57 = vadd.f32 %v2057_v19, %v2055_v26 }
0x1312   :  { %v2036_v5 = vpop.f32.mrf.mxu1 }
0x1313   :  { %v2059_v30 = vmul.f32 %v4259_v25, %v2036_v5  ;;  %v2066_v10 = vadd.f32 %v2064_v2, %v2060_v37 }
0x1314   :  { %v3557_v6 = vpop.f32.mrf.mxu1 }
0x1315   :  { %v2062_v60 = vmul.f32 %v4272_v36, %v3557_v6  ;;  %v2065_v38 = vadd.f32 %v2063_v57, %v2059_v30  ;;  %v2185_v30 = vrot.slane %v4230_v9, %v697_v47  ;;  %v2191_v57 = vrot.slane %v4230_v9, %v703_v48  ;;  %v3840_v48 = vld [vmem:[%s4460_s0 + $0x20] sm:$0xff] }
0x1316   :  { %v2046_v40 = vpop.f32.mrf.mxu1 }
0x1317   :  { %v2061_v41 = vmul.f32 %v4267_v33, %v2046_v40  ;;  %v2068_v44 = vadd.f32 %v2066_v10, %v2062_v60 }
0x1319   :  { %v2067_v43 = vadd.f32 %v2065_v38, %v2061_v41 }
0x131b   :  { %3566 = vmatprep.mubr.msk.f32.mxu0 %vm96_vm0, %v2067_v43  ;;  %v4352_v43 = vrot.slane %v4230_v9, %v4097_v3 }
0x131c   :  { %3567 = vmatmul.mubr.msk.f32.vlgmr.msra.gmra.mxu0 %vm96_vm0, %v2068_v44 }
0x13dc   :  { %v3568_v23 = vpop.f32.mrf.mxu0 }
0x13dd   :  { %v2151_v49 = vadd.f32 %v3568_v23, %v2072_v45 }
0x13de   :  { %v2145_v39 = vpop.f32.mrf.mxu0 }
0x13df   :  { %v2146_v50 = vadd.f32 %v2145_v39, %v2072_v45  ;;  %v2155_v51 = vadd.f32 %v2151_v49, %v4206_v61 }
0x13e1   :  { %v2159_v42 = vsel %vm96_vm0, %v2155_v51, 0.0  ;;  %v2154_v54 = vadd.f32 %v2146_v50, %v4208_v63  ;;  %v1560_v63 = vld [vmem:[#allocation2 + $0x140] sm:$0xff] }
0x13e2   :  { %2160 = vadd.xlane.f32.xlu0 %v2159_v42  ;;  %3571 = vmatprep.subr.mxu1 %v1560_v63 }
0x13e3   :  { %v2156_v46 = vsel %vm96_vm0, %v2154_v54, 0.0  ;;  %3572 = vmatpush3.msra.mxu1 %v1560_v63 }
0x13e4   :  { %2157 = vadd.xlane.f32.xlu1 %v2156_v46  ;;  %3573 = vmatprep.subr.mxu1 %v1559_v14 }
0x13e5   :  { %3574 = vmatpush3.msra.mxu1 %v1559_v14 }
0x13e6   :  { %3575 = vmatprep.subr.mxu1 %v1558_v28 }
0x13e7   :  { %3576 = vmatpush3.msra.mxu1 %v1558_v28  ;;  %v3844_v28 = vld [vmem:[#allocation2 + $0x240] sm:$0xff] }
0x146b   :  { %v2161_v56 = vpop.xlane.xlu0 %2160 }
0x146c   :  { %v2163_v53 = vmul.f32 0.03125, %v2161_v56 }
0x146d   :  { %v2158_v58 = vpop.xlane.xlu1 %2157 }
0x146e   :  { %v2165_v55 = vsub.f32 %v2155_v51, %v2163_v53  ;;  %v2162_v1 = vmul.f32 0.03125, %v2158_v58 }
0x1470   :  { %v2164_v52 = vsub.f32 %v2154_v54, %v2162_v1  ;;  %v2167_v59 = vmul.f32 %v2165_v55, %v2165_v55 }
0x1472   :  { %v2171_v17 = vsel %vm96_vm0, %v2167_v59, 0.0  ;;  %v2166_v24 = vmul.f32 %v2164_v52, %v2164_v52  ;;  %v3842_v59 = vld [vmem:[#allocation2 + $0x230] sm:$0xff] }
0x1473   :  { %2172 = vadd.xlane.f32.xlu0 %v2171_v17 }
0x1474   :  { %v2168_v61 = vsel %vm96_vm0, %v2166_v24, 0.0 }
0x1475   :  { %2169 = vadd.xlane.f32.xlu1 %v2168_v61  ;;  %v3843_v61 = vld [vmem:[#allocation2 + $0x228] sm:$0xff] }
0x14fc   :  { %v2173_v31 = vpop.xlane.xlu0 %2172 }
0x14fd   :  { %v2175_v13 = vmul.f32 0.03125, %v2173_v31 }
0x14fe   :  { %v2170_v19 = vpop.xlane.xlu1 %2169 }
0x14ff   :  { %v2177_v21 = vadd.f32 1e-05, %v2175_v13  ;;  %v2174_v5 = vmul.f32 0.03125, %v2170_v19 }
0x1501   :  { %3773 = vrsqrt.f32 %v2177_v21  ;;  %v2176_v26 = vadd.f32 1e-05, %v2174_v5  ;;  %v3845_v21 = vld [vmem:[#allocation2 + $0x238] sm:$0xff] }
0x1503   :  { %3775 = vrsqrt.f32 %v2176_v26 }
0x150e   :  { %v3774_v34 = vpop.eup %3773 }
0x150f   :  { %v2181_v37 = vmul.f32 %v3774_v34, %v2165_v55  ;;  %v3846_v34 = vld [vmem:[#allocation2 + $0x250] sm:$0xff] }
0x1510   :  { %v3776_v6 = vpop.eup %3775 }
0x1511   :  { %v2180_v2 = vmul.f32 %v3776_v6, %v2164_v52  ;;  %v2187_v60 = vmul.f32 %v2185_v30, %v2181_v37 }
0x1513   :  { %v2186_v40 = vmul.f32 %v2185_v30, %v2180_v2  ;;  %v4328_v38 = vadd.f32 %v2191_v57, %v2187_v60  ;;  %v3847_v2 = vld [vmem:[#allocation2 + $0x248] sm:$0xff] }
0x1515   :  { %v4330_v41 = vadd.f32 %v2191_v57, %v2186_v40  ;;  %v2195_v47 = vadd.f32 %v4220_v7, %v4328_v38 }
0x1517   :  { %v2194_v10 = vadd.f32 %v4213_v0, %v4330_v41  ;;  %v3841_v0 = vld [vmem:[%s4460_s0 + $0x28] sm:$0xff]  ;;  %s3900_s0 = smov [#allocation5]  }
0x1518   :  { %s3071_s15 = sshll.u32 %s3900_s0, 4  ;;  %s3072_s15 = int_to_ptr.vmem [resolvable:$true] %s3071_s15 }
0x1519   :  { %3577 = vmatprep.mubr.msk.f32.mxu1 %vm96_vm0, %v2194_v10  ;;  %s3871_s16 = scalar_lea.vmem %s3072_s15, 256  ;;  %p3876_p6 = scmp.lt.s32.totalorder %s3072_s15, %s3072_s15 }
0x151a   :  { %3578 = vmatmul.mubr.msk.f32.vlgmr.msra.gmra.mxu1 %vm96_vm0, %v2195_v47  ;;  %v3848_v47 = vld [vmem:[#allocation2 + $0x260] sm:$0xff]  ;;  %p3872_p5 = scmp.ne.s32.totalorder %s3072_s15, %s3871_s16  ;;  %p3877_p7 = scmp.lt.s32.totalorder %s3871_s16, %s3871_s16 }
0x151b   :  { %3580 = vmatprep.mubr.msk.f32.mxu1 %vm96_vm0, %v4076_v62 }
0x151c   :  { %p3878_p8 = por %p3877_p7, %p3876_p6 }
0x151e   :  { %3581 = vmatmul.mubr.msk.f32.gmra.mxu1 %vm96_vm0, %v4088_v4  ;;  %p3879_p9 = pnand %p3878_p8, %p3872_p5 }
0x151f   :  { %3583 = vmatprep.mubr.msk.f32.mxu1 %vm96_vm0, %v3840_v48 }
0x1522   :  { %3584 = vmatmul.mubr.msk.f32.gmra.mxu1 %vm96_vm0, %v3841_v0 }
0x15da   :  { %v3579_v7 = vpop.f32.mrf.mxu1 }
0x15db   :  { %v2278_v42 = vadd.f32 %v3579_v7, %v4352_v43 }
0x15dc   :  { %v2272_v62 = vpop.f32.mrf.mxu1 }
0x15dd   :  { %v2273_v4 = vadd.f32 %v2272_v62, %v4352_v43  ;;  %v2302_v54 = vmul.f32 %v4248_v20, %v2278_v42  ;;  %v2304_v56 = vmul.f32 %v4256_v22, %v2278_v42  ;;  %v2306_v58 = vmul.f32 %v4264_v29, %v2278_v42  ;;  %v3849_v62 = vld [vmem:[#allocation2 + $0x258] sm:$0xff] }
0x15de   :  { %v3582_v44 = vpop.f32.mrf.mxu1  ;;  %v2308_v1 = vmul.f32 %v4272_v36, %v2278_v42 }
0x15df   :  { %v2288_v45 = vadd.f32 %v3582_v44, %v4352_v43  ;;  %v2301_v23 = vmul.f32 %v4240_v27, %v2273_v4  ;;  %v2303_v46 = vmul.f32 %v4251_v32, %v2273_v4  ;;  %v2305_v53 = vmul.f32 %v4259_v25, %v2273_v4 }
0x15e0   :  { %v2282_v49 = vpop.f32.mrf.mxu1  ;;  %v2307_v55 = vmul.f32 %v4267_v33, %v2273_v4 }
0x15e1   :  { %v2283_v39 = vadd.f32 %v2282_v49, %v4352_v43  ;;  %2313 = vrot.lane.b32.xlu1 %v2288_v45, %s3898_s23  ;;  %3590 = vmatprep.mubr.msk.f32.mxu0 %vm96_vm0, %v2301_v23 }
0x15e3   :  { %2311 = vrot.lane.b32.xlu0 %v2283_v39, %s3898_s23 }
0x1653   :  { %v2314_v50 = vpop.permute.xlu1 %2313 }
0x1654   :  { %3586 = vmatprep.subr.msk.mxu0 %vm96_vm0, %v2314_v50 }
0x1655   :  { %3587 = vmatpush3.xpose.msk.msra.mxu0 %vm96_vm0, %v2314_v50  ;;  %v2312_v51 = vpop.permute.xlu0 %2311 }
0x1656   :  { %3588 = vmatprep.subr.msk.mxu0 %vm96_vm0, %v2312_v51 }
0x1659   :  { %3589 = vmatpush3.xpose.msk.msra.mxu0 %vm96_vm0, %v2312_v51 }
0x165c   :  { %3591 = vmatmul.mubr.msk.f32.vlgmr.msra.gmra.mxu0 %vm96_vm0, %v2302_v54 }
0x165d   :  { %3593 = vmatprep.mubr.msk.f32.mxu0 %vm96_vm0, %v2303_v46 }
0x1660   :  { %3594 = vmatmul.mubr.msk.f32.gmra.mxu0 %vm96_vm0, %v2304_v56 }
0x1661   :  { %3596 = vmatprep.mubr.msk.f32.mxu0 %vm96_vm0, %v2305_v53 }
0x1664   :  { %3597 = vmatmul.mubr.msk.f32.gmra.mxu0 %vm96_vm0, %v2306_v58 }
0x1665   :  { %3599 = vmatprep.mubr.msk.f32.mxu0 %vm96_vm0, %v2307_v55 }
0x1668   :  { %3600 = vmatmul.mubr.msk.f32.gmra.mxu0 %vm96_vm0, %v2308_v1 }
0x171c   :  { %v3592_v52 = vpop.f32.mrf.mxu0 }
0x171d   :  { %v2415_v17 = vadd.f32 %v3842_v59, %v3592_v52 }
0x171e   :  { %v2409_v24 = vpop.f32.mrf.mxu0 }
0x171f   :  { %v2410_v15 = vadd.f32 %v3843_v61, %v2409_v24  ;;  %v2451_v63 = vsel %vm341_vm1, %v2415_v17, -inf }
0x1720   :  { %2452 = vmax.xlane.f32.xlu0 %v2451_v63  ;;  %v3595_v14 = vpop.f32.mrf.mxu0 }
0x1721   :  { %v2425_v31 = vadd.f32 %v3844_v28, %v3595_v14  ;;  %v2448_v13 = vsel %vm341_vm1, %v2410_v15, -inf }
0x1722   :  { %v2419_v19 = vpop.f32.mrf.mxu0  ;;  %2449 = vmax.xlane.f32.xlu1 %v2448_v13 }
0x1723   :  { %v2420_v5 = vadd.f32 %v3845_v21, %v2419_v19  ;;  %v2457_v26 = vsel %vm341_vm1, %v2425_v31, -inf }
0x1724   :  { %2458 = vmax.xlane.f32.xlu0 %v2457_v26  ;;  %v3598_v30 = vpop.f32.mrf.mxu0 }
0x1725   :  { %v2435_v37 = vadd.f32 %v3846_v34, %v3598_v30  ;;  %v2454_v6 = vsel %vm341_vm1, %v2420_v5, -inf }
0x1726   :  { %v2429_v57 = vpop.f32.mrf.mxu0  ;;  %2455 = vmax.xlane.f32.xlu1 %v2454_v6 }
0x1727   :  { %v2430_v60 = vadd.f32 %v3847_v2, %v2429_v57  ;;  %v2463_v40 = vsel %vm341_vm1, %v2435_v37, -inf }
0x1728   :  { %2464 = vmax.xlane.f32.xlu0 %v2463_v40  ;;  %v3601_v10 = vpop.f32.mrf.mxu0 }
0x1729   :  { %v2445_v48 = vadd.f32 %v3848_v47, %v3601_v10  ;;  %v2460_v0 = vsel %vm341_vm1, %v2430_v60, -inf }
0x172a   :  { %v2439_v7 = vpop.f32.mrf.mxu0  ;;  %2461 = vmax.xlane.f32.xlu1 %v2460_v0 }
0x172b   :  { %v2440_v4 = vadd.f32 %v3849_v62, %v2439_v7  ;;  %v2469_v44 = vsel %vm341_vm1, %v2445_v48, -inf  ;;  %v3585_v7 = vpop.f32.mrf.mxu1 }
0x172c   :  { %2470 = vmax.xlane.f32.xlu0 %v2469_v44  ;;  %v2298_v62 = vadd.f32 %v3585_v7, %v4352_v43 }
0x172d   :  { %v2466_v45 = vsel %vm341_vm1, %v2440_v4, -inf }
0x172e   :  { %2467 = vmax.xlane.f32.xlu1 %v2466_v45 }
0x17a9   :  { %v2453_v23 = vpop.xlane.xlu0 %2452 }
0x17aa   :  { %v2473_v49 = vsub.f32 %v2415_v17, %v2453_v23 }
0x17ab   :  { %v2450_v39 = vpop.xlane.xlu1 %2449 }
0x17ac   :  { %v2482_v50 = vmul.f32 1.442695, %v2473_v49  ;;  %v2472_v51 = vsub.f32 %v2410_v15, %v2450_v39 }
0x17ad   :  { %v2459_v42 = vpop.xlane.xlu0 %2458 }
0x17ae   :  { %3777 = vpow2.f32 %v2482_v50  ;;  %v2480_v54 = vmul.f32 1.442695, %v2472_v51  ;;  %v2475_v46 = vsub.f32 %v2425_v31, %v2459_v42 }
0x17af   :  { %v2456_v56 = vpop.xlane.xlu1 %2455 }
0x17b0   :  { %3779 = vpow2.f32 %v2480_v54  ;;  %v2486_v53 = vmul.f32 1.442695, %v2475_v46  ;;  %v2474_v58 = vsub.f32 %v2420_v5, %v2456_v56 }
0x17b1   :  { %v2465_v55 = vpop.xlane.xlu0 %2464 }
0x17b2   :  { %3781 = vpow2.f32 %v2486_v53  ;;  %v2484_v1 = vmul.f32 1.442695, %v2474_v58  ;;  %v2477_v52 = vsub.f32 %v2435_v37, %v2465_v55 }
0x17b3   :  { %v2462_v59 = vpop.xlane.xlu1 %2461 }
0x17b4   :  { %3783 = vpow2.f32 %v2484_v1  ;;  %v2490_v24 = vmul.f32 1.442695, %v2477_v52  ;;  %v2476_v61 = vsub.f32 %v2430_v60, %v2462_v59 }
0x17b5   :  { %v2471_v17 = vpop.xlane.xlu0 %2470 }
0x17b6   :  { %3785 = vpow2.f32 %v2490_v24  ;;  %v2488_v63 = vmul.f32 1.442695, %v2476_v61  ;;  %v2479_v15 = vsub.f32 %v2445_v48, %v2471_v17 }
0x17b7   :  { %v2468_v14 = vpop.xlane.xlu1 %2467 }
0x17b8   :  { %3787 = vpow2.f32 %v2488_v63  ;;  %v2494_v28 = vmul.f32 1.442695, %v2479_v15  ;;  %v2478_v31 = vsub.f32 %v2440_v4, %v2468_v14  ;;  %v2292_v4 = vpop.f32.mrf.mxu1 }
0x17b9   :  { %v2293_v44 = vadd.f32 %v2292_v4, %v4352_v43 }
0x17ba   :  { %3789 = vpow2.f32 %v2494_v28  ;;  %v2492_v13 = vmul.f32 1.442695, %v2478_v31 }
0x17bb   :  { %v3778_v19 = vpop.eup %3777 }
0x17bc   :  { %3791 = vpow2.f32 %v2492_v13  ;;  %v2499_v21 = vsel %vm341_vm1, %v3778_v19, 0.0 }
0x17bd   :  { %v3780_v5 = vpop.eup %3779  ;;  %2500 = vadd.xlane.f32.xlu0 %v2499_v21  ;;  %v1564_v21 = vld [vmem:[#allocation2 + $0x160] sm:$0xff] }
0x17be   :  { %v2496_v26 = vsel %vm341_vm1, %v3780_v5, 0.0 }
0x17bf   :  { %v3782_v30 = vpop.eup %3781  ;;  %2497 = vadd.xlane.f32.xlu1 %v2496_v26  ;;  %v1562_v26 = vld [vmem:[#allocation2 + $0x150] sm:$0xff] }
0x17c0   :  { %v2505_v34 = vsel %vm341_vm1, %v3782_v30, 0.0 }
0x17c1   :  { %v3784_v37 = vpop.eup %3783  ;;  %2506 = vadd.xlane.f32.xlu0 %v2505_v34 }
0x17c2   :  { %v2502_v6 = vsel %vm341_vm1, %v3784_v37, 0.0 }
0x17c3   :  { %v3786_v57 = vpop.eup %3785  ;;  %2503 = vadd.xlane.f32.xlu1 %v2502_v6 }
0x17c4   :  { %v2511_v2 = vsel %vm341_vm1, %v3786_v57, 0.0 }
0x17c5   :  { %v3788_v60 = vpop.eup %3787  ;;  %2512 = vadd.xlane.f32.xlu0 %v2511_v2 }
0x17c6   :  { %v2508_v40 = vsel %vm341_vm1, %v3788_v60, 0.0 }
0x17c7   :  { %v3790_v10 = vpop.eup %3789  ;;  %2509 = vadd.xlane.f32.xlu1 %v2508_v40 }
0x17c8   :  { %v2517_v47 = vsel %vm341_vm1, %v3790_v10, 0.0 }
0x17c9   :  { %v3792_v48 = vpop.eup %3791  ;;  %2518 = vadd.xlane.f32.xlu0 %v2517_v47 }
0x17ca   :  { %v2514_v0 = vsel %vm341_vm1, %v3792_v48, 0.0 }
0x17cb   :  { %2515 = vadd.xlane.f32.xlu1 %v2514_v0 }
0x17dc   :  { %2540 = vrot.lane.b32.xlu1 %v2298_v62, %s3899_s24 }
0x17df   :  { %2538 = vrot.lane.b32.xlu0 %v2293_v44, %s3899_s24 }
0x1846   :  { %v2501_v45 = vpop.xlane.xlu0 %2500 }
0x1848   :  { %v2498_v23 = vpop.xlane.xlu1 %2497 }
0x1849   :  { %3793 = vrcp.f32 %v2498_v23 }
0x184a   :  { %v2507_v49 = vpop.xlane.xlu0 %2506  ;;  %3795 = vrcp.f32 %v2501_v45 }
0x184c   :  { %v2504_v39 = vpop.xlane.xlu1 %2503 }
0x184d   :  { %3797 = vrcp.f32 %v2504_v39 }
0x184e   :  { %v2513_v50 = vpop.xlane.xlu0 %2512  ;;  %3799 = vrcp.f32 %v2507_v49 }
0x1850   :  { %v2510_v51 = vpop.xlane.xlu1 %2509 }
0x1851   :  { %3801 = vrcp.f32 %v2510_v51 }
0x1852   :  { %3803 = vrcp.f32 %v2513_v50  ;;  %v2519_v42 = vpop.xlane.xlu0 %2518 }
0x1854   :  { %v2516_v54 = vpop.xlane.xlu1 %2515 }
0x1855   :  { %3805 = vrcp.f32 %v2516_v54 }
0x1856   :  { %v3794_v43 = vpop.eup %3793  ;;  %3807 = vrcp.f32 %v2519_v42  ;;  %v2539_v55 = vpop.permute.xlu0 %2538 }
0x1857   :  { %v2521_v46 = vmul.f32 %v3794_v43, %v3780_v5  ;;  %v3796_v56 = vpop.eup %3795  ;;  %v1563_v5 = vld [vmem:[#allocation2 + $0x158] sm:$0xff] }
0x1858   :  { %v2541_v53 = vpop.permute.xlu1 %2540  ;;  %v2523_v1 = vmul.f32 %v3796_v56, %v3778_v19  ;;  %v1565_v19 = vld [vmem:[#allocation2 + $0x168] sm:$0xff] }
0x1859   :  { %3602 = vmatprep.subr.mxu1 %v2541_v53  ;;  %3606 = vmatprep.mubr.msk.f32.mxu1 %vm341_vm1, %v2521_v46 }
0x185a   :  { %v3798_v58 = vpop.eup %3797  ;;  %3603 = vmatpush3.msra.mxu1 %v2541_v53  ;;  %3618 = vmatprep.subr.mxu0 %v1565_v19 }
0x185b   :  { %3604 = vmatprep.subr.mxu1 %v2539_v55  ;;  %v2525_v52 = vmul.f32 %v3798_v58, %v3784_v37  ;;  %v3800_v59 = vpop.eup %3799  ;;  %3619 = vmatpush3.msra.mxu0 %v1565_v19 }
0x185c   :  { %3605 = vmatpush3.msra.mxu1 %v2539_v55  ;;  %v2527_v61 = vmul.f32 %v3800_v59, %v3782_v30  ;;  %3620 = vmatprep.subr.mxu0 %v1564_v21  ;;  %v1567_v59 = vld [vmem:[#allocation2 + $0x178] sm:$0xff] }
0x185d   :  { %3607 = vmatmul.mubr.msk.f32.vlgmr.msra.gmra.mxu1 %vm341_vm1, %v2523_v1  ;;  %3621 = vmatpush3.msra.mxu0 %v1564_v21 }
0x185e   :  { %v3802_v24 = vpop.eup %3801  ;;  %3609 = vmatprep.mubr.msk.f32.mxu1 %vm341_vm1, %v2525_v52  ;;  %3622 = vmatprep.subr.mxu0 %v1563_v5  ;;  %v1568_v52 = vld [vmem:[#allocation2 + $0x180] sm:$0xff] }
0x185f   :  { %v2529_v17 = vmul.f32 %v3802_v24, %v3788_v60  ;;  %v3804_v63 = vpop.eup %3803  ;;  %3623 = vmatpush3.msra.mxu0 %v1563_v5  ;;  %v1566_v24 = vld [vmem:[#allocation2 + $0x170] sm:$0xff]  ;;  %v4426_v5 = vld [vmem:[#allocation2 + $0x1d8] sm:$0xff] }
0x1860   :  { %v2531_v14 = vmul.f32 %v3804_v63, %v3786_v57  ;;  %3624 = vmatprep.subr.mxu0 %v1562_v26  ;;  %v1575_v63 = vld [vmem:[#allocation2 + $0x1b8] sm:$0xff] }
0x1861   :  { %3610 = vmatmul.mubr.msk.f32.gmra.mxu1 %vm341_vm1, %v2527_v61  ;;  %3625 = vmatpush3.msra.mxu0 %v1562_v26  ;;  %v1577_v61 = vld [vmem:[#allocation2 + $0x1c8] sm:$0xff] }
0x1862   :  { %v3806_v15 = vpop.eup %3805  ;;  %3612 = vmatprep.mubr.msk.f32.mxu1 %vm341_vm1, %v2529_v17  ;;  %v1576_v17 = vld [vmem:[#allocation2 + $0x1c0] sm:$0xff]  ;;  %3640 = vmatprep.subr.mxu1 %v1577_v61 }
0x1863   :  { %v2533_v28 = vmul.f32 %v3806_v15, %v3792_v48  ;;  %v3808_v31 = vpop.eup %3807  ;;  %3641 = vmatpush3.msra.mxu1 %v1577_v61  ;;  %v1574_v15 = vld [vmem:[#allocation2 + $0x1b0] sm:$0xff] }
0x1864   :  { %v2535_v13 = vmul.f32 %v3808_v31, %v3790_v10  ;;  %3642 = vmatprep.subr.mxu1 %v1576_v17 }
0x1865   :  { %3613 = vmatmul.mubr.msk.f32.gmra.mxu1 %vm341_vm1, %v2531_v14 }
0x1866   :  { %3615 = vmatprep.mubr.msk.f32.mxu1 %vm341_vm1, %v2533_v28  ;;  %3643 = vmatpush3.msra.mxu1 %v1576_v17 }
0x1867   :  { %3644 = vmatprep.subr.mxu1 %v1575_v63 }
0x1868   :  { %3645 = vmatpush3.msra.mxu1 %v1575_v63 }
0x1869   :  { %3616 = vmatmul.mubr.msk.f32.gmra.mxu1 %vm341_vm1, %v2535_v13  ;;  %3646 = vmatprep.subr.mxu1 %v1574_v15 }
0x186a   :  { %3647 = vmatpush3.msra.mxu1 %v1574_v15 }
0x191d   :  { %v3608_v30 = vpop.f32.mrf.mxu1 }
0x191e   :  { %v2674_v48 = vmul.f32 %v4248_v20, %v3608_v30  ;;  %v2803_v30 = vrot.slane %v4426_v5, %v3955_v12  ;;  %v1571_v12 = vld [vmem:[#allocation2 + $0x198] sm:$0xff] }
0x191f   :  { %v2634_v34 = vpop.f32.mrf.mxu1 }
0x1920   :  { %v2673_v10 = vmul.f32 %v4240_v27, %v2634_v34  ;;  %v2690_v27 = vrot.slane %v4230_v9, %v4168_v18 }
0x1921   :  { %v3611_v37 = vpop.f32.mrf.mxu1 }
0x1922   :  { %v2676_v60 = vmul.f32 %v4256_v22, %v3611_v37 }
0x1923   :  { %v2644_v6 = vpop.f32.mrf.mxu1 }
0x1924   :  { %v2675_v2 = vmul.f32 %v4251_v32, %v2644_v6  ;;  %v2682_v4 = vadd.f32 %v2676_v60, %v2674_v48  ;;  %v1572_v48 = vld [vmem:[#allocation2 + $0x1a0] sm:$0xff] }
0x1925   :  { %v3614_v57 = vpop.f32.mrf.mxu1 }
0x1926   :  { %v2678_v0 = vmul.f32 %v4264_v29, %v3614_v57  ;;  %v2681_v62 = vadd.f32 %v2675_v2, %v2673_v10  ;;  %v2809_v2 = vrot.slane %v4426_v5, %v4046_v8  ;;  %v3850_v8 = vld [vmem:[#allocation2 + $0x1d0] sm:$0xff] }
0x1927   :  { %v2654_v40 = vpop.f32.mrf.mxu1 }
0x1928   :  { %v2677_v47 = vmul.f32 %v4259_v25, %v2654_v40  ;;  %v2684_v49 = vadd.f32 %v2682_v4, %v2678_v0  ;;  %v1570_v0 = vld [vmem:[#allocation2 + $0x190] sm:$0xff] }
0x1929   :  { %v3617_v7 = vpop.f32.mrf.mxu1 }
0x192a   :  { %v2680_v44 = vmul.f32 %v4272_v36, %v3617_v7  ;;  %v2683_v23 = vadd.f32 %v2681_v62, %v2677_v47  ;;  %v1573_v47 = vld [vmem:[#allocation2 + $0x1a8] sm:$0xff]  ;;  %v2815_v7 = vrot.slane %v3850_v8, %v1339_v16 }
0x192b   :  { %v2664_v45 = vpop.f32.mrf.mxu1  ;;  %3648 = vmatprep.subr.mxu1 %v1573_v47 }
0x192c   :  { %v2679_v32 = vmul.f32 %v4267_v33, %v2664_v45  ;;  %v2686_v39 = vadd.f32 %v2684_v49, %v2680_v44  ;;  %3649 = vmatpush3.msra.mxu1 %v1573_v47  ;;  %v2902_v49 = vrot.slane %v3850_v8, %v1426_v35 }
0x192d   :  { %3650 = vmatprep.subr.mxu1 %v1572_v48 }
0x192e   :  { %v2685_v22 = vadd.f32 %v2683_v23, %v2679_v32  ;;  %3651 = vmatpush3.msra.mxu1 %v1572_v48 }
0x192f   :  { %3652 = vmatprep.subr.mxu1 %v1571_v12 }
0x1930   :  { %3626 = vmatprep.mubr.msk.f32.mxu0 %vm96_vm0, %v2685_v22  ;;  %3653 = vmatpush3.msra.mxu1 %v1571_v12  ;;  %v3191_v12 = vld [vmem:[#allocation2 + $0x1e0] ss:$0 sm:$0xff] }
0x1931   :  { %3627 = vmatmul.mubr.msk.f32.vlgmr.msra.gmra.mxu0 %vm96_vm0, %v2686_v39  ;;  %3654 = vmatprep.subr.mxu1 %v1570_v0 }
0x1932   :  { %3655 = vmatpush3.msra.mxu1 %v1570_v0 }
0x19f1   :  { %v3628_v20 = vpop.f32.mrf.mxu0 }
0x19f2   :  { %v2769_v25 = vadd.f32 %v3628_v20, %v2690_v27 }
0x19f3   :  { %v2763_v29 = vpop.f32.mrf.mxu0 }
0x19f4   :  { %v2764_v50 = vadd.f32 %v2763_v29, %v2690_v27  ;;  %v2773_v36 = vadd.f32 %v2769_v25, %v4328_v38 }
0x19f6   :  { %v2772_v51 = vadd.f32 %v2764_v50, %v4330_v41  ;;  %v2777_v33 = vsel %vm96_vm0, %v2773_v36, 0.0  ;;  %v1569_v41 = vld [vmem:[#allocation2 + $0x188] sm:$0xff] }
0x19f7   :  { %2778 = vadd.xlane.f32.xlu0 %v2777_v33  ;;  %3629 = vmatprep.subr.mxu0 %v1569_v41 }
0x19f8   :  { %v2774_v42 = vsel %vm96_vm0, %v2772_v51, 0.0  ;;  %3630 = vmatpush3.msra.mxu0 %v1569_v41  ;;  %v3015_v41 = vrot.slane %v4426_v5, %v4097_v3 }
0x19f9   :  { %2775 = vadd.xlane.f32.xlu1 %v2774_v42  ;;  %3631 = vmatprep.subr.mxu0 %v1568_v52 }
0x19fa   :  { %3632 = vmatpush3.msra.mxu0 %v1568_v52 }
0x19fb   :  { %3633 = vmatprep.subr.mxu0 %v1567_v59 }
0x19fc   :  { %3634 = vmatpush3.msra.mxu0 %v1567_v59 }
0x19fd   :  { %3635 = vmatprep.subr.mxu0 %v1566_v24 }
0x19fe   :  { %3636 = vmatpush3.msra.mxu0 %v1566_v24  ;;  %v3021_v24 = vrot.slane %v4426_v5, %v4168_v18 }
0x1a80   :  { %v2779_v54 = vpop.xlane.xlu0 %2778 }
0x1a81   :  { %v2781_v43 = vmul.f32 0.03125, %v2779_v54 }
0x1a82   :  { %v2776_v46 = vpop.xlane.xlu1 %2775 }
0x1a83   :  { %v2783_v56 = vsub.f32 %v2773_v36, %v2781_v43  ;;  %v2780_v53 = vmul.f32 0.03125, %v2776_v46 }
0x1a85   :  { %v2782_v9 = vsub.f32 %v2772_v51, %v2780_v53  ;;  %v2785_v58 = vmul.f32 %v2783_v56, %v2783_v56 }
0x1a87   :  { %v2789_v55 = vsel %vm96_vm0, %v2785_v58, 0.0  ;;  %v2784_v1 = vmul.f32 %v2782_v9, %v2782_v9 }
0x1a88   :  { %2790 = vadd.xlane.f32.xlu0 %v2789_v55 }
0x1a89   :  { %v2786_v38 = vsel %vm96_vm0, %v2784_v1, 0.0 }
0x1a8a   :  { %2787 = vadd.xlane.f32.xlu1 %v2786_v38 }
0x1b11   :  { %v2791_v14 = vpop.xlane.xlu0 %2790 }
0x1b12   :  { %v2793_v28 = vmul.f32 0.03125, %v2791_v14 }
0x1b13   :  { %v2788_v31 = vpop.xlane.xlu1 %2787 }
0x1b14   :  { %v2795_v13 = vadd.f32 1e-05, %v2793_v28  ;;  %v2792_v19 = vmul.f32 0.03125, %v2788_v31 }
0x1b16   :  { %3809 = vrsqrt.f32 %v2795_v13  ;;  %v2794_v21 = vadd.f32 1e-05, %v2792_v19 }
0x1b18   :  { %3811 = vrsqrt.f32 %v2794_v21 }
0x1b23   :  { %v3810_v26 = vpop.eup %3809 }
0x1b24   :  { %v2799_v34 = vmul.f32 %v3810_v26, %v2783_v56 }
0x1b25   :  { %v3812_v37 = vpop.eup %3811 }
0x1b26   :  { %v2798_v6 = vmul.f32 %v3812_v37, %v2782_v9  ;;  %v2805_v57 = vmul.f32 %v2803_v30, %v2799_v34 }
0x1b28   :  { %v2804_v60 = vmul.f32 %v2803_v30, %v2798_v6  ;;  %v2811_v10 = vadd.f32 %v2809_v2, %v2805_v57 }
0x1b2a   :  { %v2810_v40 = vadd.f32 %v2809_v2, %v2804_v60 }
0x1b2c   :  { %3637 = vmatprep.mubr.msk.f32.mxu0 %vm96_vm0, %v2810_v40 }
0x1b2d   :  { %3638 = vmatmul.mubr.msk.f32.vlgmr.msra.gmra.mxu0 %vm96_vm0, %v2811_v10 }
0x1bed   :  { %v3639_v62 = vpop.f32.mrf.mxu0 }
0x1bee   :  { %v2894_v4 = vadd.f32 %v3639_v62, %v2815_v7 }
0x1bef   :  { %v2888_v44 = vpop.f32.mrf.mxu0 }
0x1bf0   :  { %v2889_v45 = vadd.f32 %v2888_v44, %v2815_v7  ;;  %v2898_v32 = vmax.f32 %v2894_v4, 0.0  ;;  %v3192_v7 = vld [vmem:[#allocation2 + $0x1e1] ss:$0 sm:$0xff] }
0x1bf2   :  { %v2897_v23 = vmax.f32 %v2889_v45, 0.0 }
0x1bf4   :  { %3656 = vmatprep.mubr.msk.f32.mxu1 %vm1428_vm2, %v2897_v23 }
0x1bf5   :  { %3657 = vmatmul.mubr.msk.f32.vlgmr.msra.gmra.mxu1 %vm1428_vm2, %v2898_v32 }
0x1cb5   :  { %v3658_v22 = vpop.f32.mrf.mxu1 }
0x1cb6   :  { %v2981_v39 = vadd.f32 %v3658_v22, %v2902_v49 }
0x1cb7   :  { %v2975_v27 = vpop.f32.mrf.mxu1 }
0x1cb8   :  { %v2976_v20 = vadd.f32 %v2975_v27, %v2902_v49  ;;  %v2985_v25 = vadd.f32 %v2981_v39, %v2811_v10 }
0x1cba   :  { %v2984_v29 = vadd.f32 %v2976_v20, %v2810_v40  ;;  %v2989_v16 = vsel %vm96_vm0, %v2985_v25, 0.0 }
0x1cbb   :  { %2990 = vadd.xlane.f32.xlu0 %v2989_v16 }
0x1cbc   :  { %v2986_v50 = vsel %vm96_vm0, %v2984_v29, 0.0 }
0x1cbd   :  { %2987 = vadd.xlane.f32.xlu1 %v2986_v50 }
0x1d44   :  { %v2991_v36 = vpop.xlane.xlu0 %2990 }
0x1d45   :  { %v2993_v51 = vmul.f32 0.03125, %v2991_v36 }
0x1d46   :  { %v2988_v33 = vpop.xlane.xlu1 %2987 }
0x1d47   :  { %v2995_v42 = vsub.f32 %v2985_v25, %v2993_v51  ;;  %v2992_v54 = vmul.f32 0.03125, %v2988_v33 }
0x1d49   :  { %v2994_v43 = vsub.f32 %v2984_v29, %v2992_v54  ;;  %v2997_v11 = vmul.f32 %v2995_v42, %v2995_v42 }
0x1d4b   :  { %v3001_v35 = vsel %vm96_vm0, %v2997_v11, 0.0  ;;  %v2996_v46 = vmul.f32 %v2994_v43, %v2994_v43 }
0x1d4c   :  { %3002 = vadd.xlane.f32.xlu0 %v3001_v35 }
0x1d4d   :  { %v2998_v56 = vsel %vm96_vm0, %v2996_v46, 0.0 }
0x1d4e   :  { %2999 = vadd.xlane.f32.xlu1 %v2998_v56 }
0x1dd5   :  { %v3003_v53 = vpop.xlane.xlu0 %3002 }
0x1dd6   :  { %v3005_v9 = vmul.f32 0.03125, %v3003_v53 }
0x1dd7   :  { %v3000_v58 = vpop.xlane.xlu1 %2999 }
0x1dd8   :  { %v3007_v55 = vadd.f32 1e-05, %v3005_v9  ;;  %v3004_v1 = vmul.f32 0.03125, %v3000_v58 }
0x1dda   :  { %3813 = vrsqrt.f32 %v3007_v55  ;;  %v3006_v38 = vadd.f32 1e-05, %v3004_v1 }
0x1ddc   :  { %3815 = vrsqrt.f32 %v3006_v38 }
0x1de7   :  { %v3814_v52 = vpop.eup %3813 }
0x1de8   :  { %v3011_v59 = vmul.f32 %v3814_v52, %v2995_v42 }
0x1de9   :  { %v3816_v61 = vpop.eup %3815 }
0x1dea   :  { %v3017_v17 = vmul.f32 %v3015_v41, %v3011_v59  ;;  %v3010_v63 = vmul.f32 %v3816_v61, %v2994_v43 }
0x1dec   :  { %v3023_v15 = vadd.f32 %v3021_v24, %v3017_v17  ;;  %v3016_v14 = vmul.f32 %v3015_v41, %v3010_v63 }
0x1dee   :  { %v3029_v28 = vsel %vm96_vm0, %v3023_v15, 0.0  ;;  %v3022_v31 = vadd.f32 %v3021_v24, %v3016_v14 }
0x1def   :  { %3030 = vadd.xlane.f32.xlu0 %v3029_v28 }
0x1df0   :  { %v3026_v13 = vsel %vm96_vm0, %v3022_v31, 0.0 }
0x1df1   :  { %3027 = vadd.xlane.f32.xlu1 %v3026_v13 }
0x1e78   :  { %v3031_v19 = vpop.xlane.xlu0 %3030 }
0x1e79   :  { %v3033_v21 = vmul.f32 0.03125, %v3031_v19 }
0x1e7a   :  { %v3028_v3 = vpop.xlane.xlu1 %3027 }
0x1e7b   :  { %v3035_v26 = vsub.f32 %v3023_v15, %v3033_v21  ;;  %v3032_v30 = vmul.f32 0.03125, %v3028_v3 }
0x1e7d   :  { %v3034_v34 = vsub.f32 %v3022_v31, %v3032_v30  ;;  %v3037_v37 = vmul.f32 %v3035_v26, %v3035_v26 }
0x1e7f   :  { %v3041_v18 = vsel %vm96_vm0, %v3037_v37, 0.0  ;;  %v3036_v5 = vmul.f32 %v3034_v34, %v3034_v34 }
0x1e80   :  { %3042 = vadd.xlane.f32.xlu0 %v3041_v18 }
0x1e81   :  { %v3038_v6 = vsel %vm96_vm0, %v3036_v5, 0.0 }
0x1e82   :  { %3039 = vadd.xlane.f32.xlu1 %v3038_v6 }
0x1f09   :  { %v3043_v57 = vpop.xlane.xlu0 %3042 }
0x1f0a   :  { %v3045_v2 = vmul.f32 0.03125, %v3043_v57 }
0x1f0b   :  { %v3040_v60 = vpop.xlane.xlu1 %3039 }
0x1f0c   :  { %v3047_v40 = vadd.f32 1e-05, %v3045_v2  ;;  %v3044_v10 = vmul.f32 0.03125, %v3040_v60 }
0x1f0e   :  { %3817 = vrsqrt.f32 %v3047_v40  ;;  %v3046_v47 = vadd.f32 1e-05, %v3044_v10 }
0x1f10   :  { %3819 = vrsqrt.f32 %v3046_v47 }
0x1f1b   :  { %v3818_v48 = vpop.eup %3817 }
0x1f1c   :  { %v3051_v0 = vmul.f32 %v3818_v48, %v3035_v26 }
0x1f1d   :  { %v3820_v8 = vpop.eup %3819 }
0x1f1e   :  { %v3050_v62 = vmul.f32 %v3820_v8, %v3034_v34  ;;  %v3057_v4 = vmul.f32 %v3191_v12, %v3051_v0 }
0x1f20   :  { %v3056_v44 = vmul.f32 %v3191_v12, %v3050_v62  ;;  %v3063_v45 = vadd.f32 %v3192_v7, %v3057_v4 }
0x1f22   :  { %v3062_v23 = vadd.f32 %v3192_v7, %v3056_v44  ;;  %3065 = vst.msk [vmem:[#allocation5 + $0x8] sm:$0xff] %vm96_vm0, %v3063_v45 }
0x1f24   :  { %3064 = vst.msk [vmem:[#allocation5] sm:$0xff] %vm96_vm0, %v3062_v23 }
0x1f25   :  { %3882 = shalt.err (!%p3879_p9)
}
0x1f26   :  { %3077 = dma.vmem_to_hbm [thread:$0]  %s3072_s15, 256, %s4462_s2, [#allocation4], %s3896_s12, %s3896_s12, %s3897_s13  }
0x1f27   :  { %3893 = dma.done.wait [#allocation4], 256  }
0x1f28   :  { %3894 = vsyncadd [#allocation4], 4294967040 }
0x1f29   :  { %3081 = vsyncpa [#allocation3], 1 }
0x1f2a   :  { %3082 = vsyncpa [#allocation4], 1 }

</bundles_post_ra>
